<compile_context>
chip_gen: v7x
topology: tpu7x:2x2x1
jax: 0.10.0
libtpu: 0.0.40
codegen_flags: <defaults>
</compile_context>

<pallas_src>
import functools

import jax
import jax.numpy as jnp
from jax import lax
from jax.experimental import pallas as pl
from jax.experimental.pallas import tpu as pltpu


def _convlstm_step_kernel(gx_ref, wht_ref, mask_ref, hy_ref, gates_ref,
                          hx_s, cx_s, g_s, *, F, W, KS, M):
    """One ConvLSTM timestep for all V variables at once (grid = (S,)).

    gx_ref:    (4F, M)        f32  precomputed W_x (*) x_t + bias, this step
    wht_ref:   (4F, KS*KS*F)  bf16 hidden-state conv weight, im2col layout
    mask_ref:  (KS*KS*F, M)   f32  0/1 spatial-boundary mask per tap
    hy_ref:    (F, M)         f32  hidden-state output, this step
    gates_ref: (4F, M)        f32  pre-activation gates output, this step
    hx_s, cx_s:(F, M)         f32  recurrent state carried across grid steps
    g_s:       (4F, M)        f32  gates staging (lets t == 0 skip the matmul)

    M = V*B*H*W is flattened in (v, b, h, w) order and sits on lanes.
    """
    P = KS // 2
    t = pl.program_id(0)

    @pl.when(t == 0)
    def _():
        # hx == cx == 0 at t = 0: the recurrent conv contributes nothing, so
        # skip the im2col + matmul entirely (peeled first step).
        cx_s[...] = jnp.zeros_like(cx_s)
        g_s[...] = gx_ref[...]

    @pl.when(t > 0)
    def _():
        hx = hx_s[...]                                        # (F, M) f32
        # im2col via lane rotations: tap (kh, kw) needs hx at spatial offset
        # (kh-P, kw-P), i.e. flat offset off = (kh-P)*W + (kw-P).  Boundary
        # (and cross-image) wraparound is zeroed by the precomputed mask.
        taps = []
        for kh in range(KS):
            for kw in range(KS):
                off = (kh - P) * W + (kw - P)
                if off == 0:
                    taps.append(hx)
                else:
                    taps.append(pltpu.roll(hx, shift=(-off) % M, axis=1))
        raw = jnp.concatenate(taps, axis=0)                   # (KS*KS*F, M)
        patches = (raw * mask_ref[...]).astype(jnp.bfloat16)  # MXU operand
        g_s[...] = jnp.dot(wht_ref[...], patches,
                           preferred_element_type=jnp.float32) + gx_ref[...]

    # --- LSTM elementwise math, lane-dense (M on lanes), f32 / EUP path.
    gates = g_s[...]                                          # (4F, M)
    ingate = jax.nn.sigmoid(gates[0 * F:1 * F])
    forgetgate = jax.nn.sigmoid(gates[1 * F:2 * F])
    cellgate = gates[2 * F:3 * F]
    outgate = jax.nn.sigmoid(gates[3 * F:4 * F])

    cy = forgetgate * cx_s[...] + ingate * cellgate
    hy = outgate * jnp.tanh(cy)

    gates_ref[...] = gates
    hy_ref[...] = hy
    cx_s[...] = cy
    hx_s[...] = hy


def conv_lstm_block(inputs, w, b, *, num_features, num_variables):
    """ConvLSTMBlock.forward.

    inputs: (B, S, C, H, W) float32 (PyTorch layout); C == num_variables or
            C == num_features * num_variables.
    w:      (KS, KS, C//num_variables + num_features, 4*num_features)  HWIO
    b:      (4 * num_features,)
    Returns (stackedOutputs7, gatesList7):
      stackedOutputs7: (B, S, num_variables*num_features, H, W)
      gatesList7:      nested list [V][S] of (B, 4*num_features, H, W)
    """
    B, S, C, H, W = inputs.shape
    F, V = num_features, num_variables
    assert C % V == 0
    CINV = C // V
    CIN = CINV + F
    KS = w.shape[0]
    P = KS // 2
    assert KS % 2 == 1, "SAME padding assumes an odd kernel size"
    assert P < H and P < W
    assert w.shape == (KS, KS, CIN, 4 * F)
    M = V * B * H * W          # fused lane axis: (v, b, h, w) flattened

    # Split the gate conv weight: combined = cat([x, hx], channel).
    w_x = w[:, :, :CINV, :]                                    # (KS,KS,CINV,4F)
    wht = jnp.transpose(
        w[:, :, CINV:, :].reshape(KS * KS * F, 4 * F)          # im2col layout
    ).astype(jnp.bfloat16)                                     # (4F, KS*KS*F)

    # Hoisted, non-recurrent input-to-gate conv over ALL (V,S,B) frames at
    # once (bias folded in); default bf16 MXU precision (review item 8).
    # NOTE(v5e): gx could additionally be stored bf16 to halve the dominant
    # HBM stream; kept f32 so the returned pre-activation gates stay f32.
    x_r = jnp.transpose(inputs.reshape(B, S, V, CINV, H, W), (2, 1, 0, 4, 5, 3))
    gx = lax.conv_general_dilated(
        x_r.reshape(V * S * B, H, W, CINV), w_x, (1, 1), "SAME",
        dimension_numbers=("NHWC", "HWIO", "NHWC"))
    gx = (gx + b.reshape(1, 1, 1, 4 * F)).reshape(V, S, B, H, W, 4 * F)
    gx = jnp.transpose(gx, (1, 5, 0, 2, 3, 4)).reshape(S, 4 * F, M)

    # Per-tap 0/1 boundary masks for the roll-based im2col (time-invariant,
    # loaded into VMEM once and kept resident across grid steps).
    m_idx = jnp.arange(M, dtype=jnp.int32)
    w_idx = m_idx % W
    h_idx = (m_idx // W) % H
    rows = []
    for kh in range(KS):
        for kw in range(KS):
            dy, dx = kh - P, kw - P
            valid = ((h_idx + dy >= 0) & (h_idx + dy < H) &
                     (w_idx + dx >= 0) & (w_idx + dx < W))
            rows.append(jnp.broadcast_to(valid.astype(jnp.float32)[None, :],
                                         (F, M)))
    mask = jnp.concatenate(rows, axis=0)                       # (KS*KS*F, M)

    kernel = functools.partial(_convlstm_step_kernel, F=F, W=W, KS=KS, M=M)

    # TODO(synk): on v7x a leading "parallel" grid axis splitting M by
    # (variable, batch) groups would engage the second TensorCore; omitted to
    # keep the recurrence a single clean "arbitrary" time axis.
    hy, gates = pl.pallas_call(
        kernel,
        out_shape=(
            jax.ShapeDtypeStruct((S, F, M), jnp.float32),
            jax.ShapeDtypeStruct((S, 4 * F, M), jnp.float32),
        ),
        grid_spec=pltpu.PrefetchScalarGridSpec(
            num_scalar_prefetch=0,
            grid=(S,),
            in_specs=[
                pl.BlockSpec((None, 4 * F, M), lambda t: (t, 0, 0)),
                pl.BlockSpec((4 * F, KS * KS * F), lambda t: (0, 0)),
                pl.BlockSpec((KS * KS * F, M), lambda t: (0, 0)),
            ],
            out_specs=[
                pl.BlockSpec((None, F, M), lambda t: (t, 0, 0)),
                pl.BlockSpec((None, 4 * F, M), lambda t: (t, 0, 0)),
            ],
            scratch_shapes=[
                pltpu.VMEM((F, M), jnp.float32),        # hx (f32, carried)
                pltpu.VMEM((F, M), jnp.float32),        # cx (f32, carried)
                pltpu.VMEM((4 * F, M), jnp.float32),    # gates staging
            ],
        ),
        compiler_params=pltpu.CompilerParams(
            dimension_semantics=("arbitrary",)),
    )(gx, wht, mask)

    # hy: (S, F, M) -> stackedOutputs7 (B, S, V*F, H, W)
    stacked = jnp.transpose(hy.reshape(S, F, V, B, H, W),
                            (3, 0, 2, 1, 4, 5)).reshape(B, S, V * F, H, W)
    # gates: (S, 4F, M) -> nested list [V][S] of (B, 4F, H, W), matching the
    # PyTorch module's return type.
    gates_nchw = jnp.transpose(gates.reshape(S, 4 * F, V, B, H, W),
                               (2, 0, 3, 1, 4, 5))
    gates_list7 = [[gates_nchw[c, t] for t in range(S)] for c in range(V)]
    return stacked, gates_list7


def reference(inputs, w, b, num_features, num_variables):
    """Pure-JAX (f32, HIGHEST precision) reference of the PyTorch forward."""
    B, S, C, H, W = inputs.shape
    F, V = num_features, num_variables
    cin = C // V
    outs_v, gates_v = [], []
    for c in range(V):
        hx = jnp.zeros((B, H, W, F), jnp.float32)
        cx = jnp.zeros((B, H, W, F), jnp.float32)
        outs_t, gates_t = [], []
        for t in range(S):
            x = jnp.transpose(inputs[:, t, c * cin:(c + 1) * cin], (0, 2, 3, 1))
            comb = jnp.concatenate([x, hx], axis=-1)
            g = lax.conv_general_dilated(
                comb, w, (1, 1), "SAME",
                dimension_numbers=("NHWC", "HWIO", "NHWC"),
                precision=lax.Precision.HIGHEST,
            ) + b.reshape(1, 1, 1, -1)
            i = jax.nn.sigmoid(g[..., :F])
            f = jax.nn.sigmoid(g[..., F:2 * F])
            gg = g[..., 2 * F:3 * F]
            o = jax.nn.sigmoid(g[..., 3 * F:])
            cy = f * cx + i * gg
            hy = o * jnp.tanh(cy)
            outs_t.append(hy)
            gates_t.append(g)
            hx, cx = hy, cy
        outs_v.append(jnp.stack(outs_t, axis=1))      # (B, S, H, W, F)
        gates_v.append(jnp.stack(gates_t, axis=0))    # (S, B, H, W, 4F)
    stacked = jnp.stack(outs_v, axis=2)               # (B, S, V, H, W, F)
    stacked = jnp.transpose(stacked, (0, 1, 2, 5, 3, 4)).reshape(
        B, S, V * F, H, W)
    gates = jnp.transpose(jnp.stack(gates_v, axis=0), (0, 1, 2, 5, 3, 4))
    return stacked, gates                             # (V, S, B, 4F, H, W)


if __name__ == "__main__":
    B, S, V, F, H, W = 2, 4, 7, 8, 8, 8
    C = V          # in_channels == num_variables -> one channel per variable
    KS = 3
    CIN = C // V + F

    key = jax.random.PRNGKey(0)
    k_x, k_w, k_b = jax.random.split(key, 3)
    inputs = jax.random.normal(k_x, (B, S, C, H, W), jnp.float32)
    w = jax.random.normal(k_w, (KS, KS, CIN, 4 * F), jnp.float32) * 0.1
    b = jax.random.normal(k_b, (4 * F,), jnp.float32) * 0.1

    stacked, gates_list7 = conv_lstm_block(
        inputs, w, b, num_features=F, num_variables=V)
    jax.block_until_ready(stacked)

    ref_stacked, ref_gates = reference(inputs, w, b, F, V)
    gates_arr = jnp.stack([jnp.stack(gl, axis=0) for gl in gates_list7], axis=0)

    # Both the hoisted x-conv (default MXU precision) and the recurrent conv
    # (bf16 operands, f32 accumulation) are bf16-level, so compare against the
    # f32/HIGHEST reference with a correspondingly relaxed tolerance.
    assert stacked.shape == (B, S, V * F, H, W)
    assert gates_arr.shape == (V, S, B, 4 * F, H, W)
    assert jnp.allclose(stacked, ref_stacked, atol=3e-2, rtol=3e-2)
    assert jnp.allclose(gates_arr, ref_gates, atol=3e-2, rtol=3e-2)
    print("KERNEL_OK")
</pallas_src>

<mosaic_0001>
module attributes {stable_mosaic.version = 11 : i64} {
  func.func @_convlstm_step_kernel(%arg0: i32, %arg1: memref<1x32x896xf32, #tpu.memory_space<vmem>>, %arg2: memref<32x72xbf16, #tpu.memory_space<vmem>>, %arg3: memref<72x896xf32, #tpu.memory_space<vmem>>, %arg4: memref<1x8x896xf32, #tpu.memory_space<vmem>>, %arg5: memref<1x32x896xf32, #tpu.memory_space<vmem>>, %arg6: memref<8x896xf32, #tpu.memory_space<vmem>>, %arg7: memref<8x896xf32, #tpu.memory_space<vmem>>, %arg8: memref<32x896xf32, #tpu.memory_space<vmem>>) attributes {dimension_semantics = [#tpu.dimension_semantics<arbitrary>], iteration_bounds = array<i64: 4>, scalar_prefetch = 0 : i64, scratch_operands = 3 : i64, tpu.core_type = #tpu.core_type<tc>, window_params = [{transform_indices = @transform_0, window_bounds = array<i64: 1, 32, 896>}, {pipeline_mode = #tpu.pipeline_mode<synchronous>, transform_indices = @transform_1, window_bounds = array<i64: 32, 72>}, {pipeline_mode = #tpu.pipeline_mode<synchronous>, transform_indices = @transform_2, window_bounds = array<i64: 72, 896>}, {transform_indices = @transform_3, window_bounds = array<i64: 1, 8, 896>}, {transform_indices = @transform_4, window_bounds = array<i64: 1, 32, 896>}]} {
    %c0_i32 = arith.constant 0 : i32
    %0 = arith.cmpi eq, %arg0, %c0_i32 : i32
    %1 = arith.extui %0 : i1 to i32
    %c0_i32_0 = arith.constant 0 : i32
    %2 = arith.cmpi ne, %1, %c0_i32_0 : i32
    scf.if %2 {
      %cst_18 = arith.constant 0.000000e+00 : f32
      %40 = vector.broadcast %cst_18 : f32 to vector<8x896xf32>
      %c0_19 = arith.constant 0 : index
      %c0_20 = arith.constant 0 : index
      %41 = vector.load %arg7[%c0_19, %c0_20] : memref<8x896xf32, #tpu.memory_space<vmem>>, vector<8x896xf32>
      tpu.vector_store %arg7[%c0_19, %c0_20], %40 {strides = array<i32>} : memref<8x896xf32, #tpu.memory_space<vmem>>, vector<8x896xf32>,
      %c0_21 = arith.constant 0 : index
      %c0_22 = arith.constant 0 : index
      %c0_23 = arith.constant 0 : index
      %42 = vector.load %arg1[%c0_21, %c0_22, %c0_23] : memref<1x32x896xf32, #tpu.memory_space<vmem>>, vector<1x32x896xf32>
      %43 = vector.shape_cast %42 : vector<1x32x896xf32> to vector<32x896xf32>
      %c0_24 = arith.constant 0 : index
      %c0_25 = arith.constant 0 : index
      %44 = vector.load %arg8[%c0_24, %c0_25] : memref<32x896xf32, #tpu.memory_space<vmem>>, vector<32x896xf32>
      tpu.vector_store %arg8[%c0_24, %c0_25], %43 {strides = array<i32>} : memref<32x896xf32, #tpu.memory_space<vmem>>, vector<32x896xf32>,
    } else {
    }
    %c0_i32_1 = arith.constant 0 : i32
    %3 = arith.cmpi sgt, %arg0, %c0_i32_1 : i32
    %4 = arith.extui %3 : i1 to i32
    %c0_i32_2 = arith.constant 0 : i32
    %5 = arith.cmpi ne, %4, %c0_i32_2 : i32
    scf.if %5 {
      %c0_18 = arith.constant 0 : index
      %c0_19 = arith.constant 0 : index
      %40 = vector.load %arg6[%c0_18, %c0_19] : memref<8x896xf32, #tpu.memory_space<vmem>>, vector<8x896xf32>
      %c9_i32 = arith.constant 9 : i32
      %41 = tpu.dynamic_rotate %40 by %c9_i32 dim 1 : vector<8x896xf32>, i32 -> vector<8x896xf32>
      %c8_i32 = arith.constant 8 : i32
      %42 = tpu.dynamic_rotate %40 by %c8_i32 dim 1 : vector<8x896xf32>, i32 -> vector<8x896xf32>
      %c7_i32 = arith.constant 7 : i32
      %43 = tpu.dynamic_rotate %40 by %c7_i32 dim 1 : vector<8x896xf32>, i32 -> vector<8x896xf32>
      %c1_i32 = arith.constant 1 : i32
      %44 = tpu.dynamic_rotate %40 by %c1_i32 dim 1 : vector<8x896xf32>, i32 -> vector<8x896xf32>
      %c895_i32 = arith.constant 895 : i32
      %45 = tpu.dynamic_rotate %40 by %c895_i32 dim 1 : vector<8x896xf32>, i32 -> vector<8x896xf32>
      %c889_i32 = arith.constant 889 : i32
      %46 = tpu.dynamic_rotate %40 by %c889_i32 dim 1 : vector<8x896xf32>, i32 -> vector<8x896xf32>
      %c888_i32 = arith.constant 888 : i32
      %47 = tpu.dynamic_rotate %40 by %c888_i32 dim 1 : vector<8x896xf32>, i32 -> vector<8x896xf32>
      %c887_i32 = arith.constant 887 : i32
      %48 = tpu.dynamic_rotate %40 by %c887_i32 dim 1 : vector<8x896xf32>, i32 -> vector<8x896xf32>
      %49 = tpu.concatenate %41, %42, %43, %44, %40, %45, %46, %47, %48 in 0 : vector<8x896xf32>, vector<8x896xf32>, vector<8x896xf32>, vector<8x896xf32>, vector<8x896xf32>, vector<8x896xf32>, vector<8x896xf32>, vector<8x896xf32>, vector<8x896xf32> -> vector<72x896xf32>
      %c0_20 = arith.constant 0 : index
      %c0_21 = arith.constant 0 : index
      %50 = vector.load %arg3[%c0_20, %c0_21] : memref<72x896xf32, #tpu.memory_space<vmem>>, vector<72x896xf32>
      %51 = arith.mulf %49, %50 : vector<72x896xf32>
      %52 = arith.truncf %51 : vector<72x896xf32> to vector<72x896xbf16>
      %c0_22 = arith.constant 0 : index
      %c0_23 = arith.constant 0 : index
      %53 = vector.load %arg2[%c0_22, %c0_23] : memref<32x72xbf16, #tpu.memory_space<vmem>>, vector<32x72xbf16>
      %cst_24 = arith.constant dense<0.000000e+00> : vector<32x896xf32>
      %54 = tpu.matmul %53, %52, %cst_24 {dimension_numbers = #tpu.dot_dimension_numbers<[1], [0], [0], [1], [0, 0, 1, 1], [], []>} : vector<32x72xbf16>, vector<72x896xbf16>, vector<32x896xf32> -> vector<32x896xf32>
      %c0_25 = arith.constant 0 : index
      %c0_26 = arith.constant 0 : index
      %c0_27 = arith.constant 0 : index
      %55 = vector.load %arg1[%c0_25, %c0_26, %c0_27] : memref<1x32x896xf32, #tpu.memory_space<vmem>>, vector<1x32x896xf32>
      %56 = vector.shape_cast %55 : vector<1x32x896xf32> to vector<32x896xf32>
      %57 = arith.addf %54, %56 : vector<32x896xf32>
      %c0_28 = arith.constant 0 : index
      %c0_29 = arith.constant 0 : index
      %58 = vector.load %arg8[%c0_28, %c0_29] : memref<32x896xf32, #tpu.memory_space<vmem>>, vector<32x896xf32>
      tpu.vector_store %arg8[%c0_28, %c0_29], %57 {strides = array<i32>} : memref<32x896xf32, #tpu.memory_space<vmem>>, vector<32x896xf32>,
    } else {
    }
    %c0 = arith.constant 0 : index
    %c0_3 = arith.constant 0 : index
    %6 = vector.load %arg8[%c0, %c0_3] : memref<32x896xf32, #tpu.memory_space<vmem>>, vector<32x896xf32>
    %7 = vector.extract_strided_slice %6 {offsets = [0, 0], sizes = [8, 896], strides = [1, 1]} : vector<32x896xf32> to vector<8x896xf32>
    %8 = arith.negf %7 : vector<8x896xf32>
    %9 = math.exp %8 : vector<8x896xf32>
    %cst = arith.constant 1.000000e+00 : f32
    %10 = vector.broadcast %cst : f32 to vector<8x896xf32>
    %11 = arith.addf %10, %9 : vector<8x896xf32>
    %12 = arith.divf %10, %11 : vector<8x896xf32>
    %13 = vector.extract_strided_slice %6 {offsets = [8, 0], sizes = [8, 896], strides = [1, 1]} : vector<32x896xf32> to vector<8x896xf32>
    %14 = arith.negf %13 : vector<8x896xf32>
    %15 = math.exp %14 : vector<8x896xf32>
    %cst_4 = arith.constant 1.000000e+00 : f32
    %16 = vector.broadcast %cst_4 : f32 to vector<8x896xf32>
    %17 = arith.addf %16, %15 : vector<8x896xf32>
    %18 = arith.divf %16, %17 : vector<8x896xf32>
    %19 = vector.extract_strided_slice %6 {offsets = [16, 0], sizes = [8, 896], strides = [1, 1]} : vector<32x896xf32> to vector<8x896xf32>
    %20 = vector.extract_strided_slice %6 {offsets = [24, 0], sizes = [8, 896], strides = [1, 1]} : vector<32x896xf32> to vector<8x896xf32>
    %21 = arith.negf %20 : vector<8x896xf32>
    %22 = math.exp %21 : vector<8x896xf32>
    %cst_5 = arith.constant 1.000000e+00 : f32
    %23 = vector.broadcast %cst_5 : f32 to vector<8x896xf32>
    %24 = arith.addf %23, %22 : vector<8x896xf32>
    %25 = arith.divf %23, %24 : vector<8x896xf32>
    %c0_6 = arith.constant 0 : index
    %c0_7 = arith.constant 0 : index
    %26 = vector.load %arg7[%c0_6, %c0_7] : memref<8x896xf32, #tpu.memory_space<vmem>>, vector<8x896xf32>
    %27 = arith.mulf %18, %26 : vector<8x896xf32>
    %28 = arith.mulf %12, %19 : vector<8x896xf32>
    %29 = arith.addf %27, %28 : vector<8x896xf32>
    %30 = math.tanh %29 : vector<8x896xf32>
    %31 = arith.mulf %25, %30 : vector<8x896xf32>
    %c0_8 = arith.constant 0 : index
    %c0_9 = arith.constant 0 : index
    %c0_10 = arith.constant 0 : index
    %32 = vector.load %arg5[%c0_8, %c0_9, %c0_10] : memref<1x32x896xf32, #tpu.memory_space<vmem>>, vector<1x32x896xf32>
    %33 = vector.shape_cast %32 : vector<1x32x896xf32> to vector<32x896xf32>
    %34 = vector.shape_cast %6 : vector<32x896xf32> to vector<1x32x896xf32>
    tpu.vector_store %arg5[%c0_8, %c0_9, %c0_10], %34 {strides = array<i32>} : memref<1x32x896xf32, #tpu.memory_space<vmem>>, vector<1x32x896xf32>,
    %c0_11 = arith.constant 0 : index
    %c0_12 = arith.constant 0 : index
    %c0_13 = arith.constant 0 : index
    %35 = vector.load %arg4[%c0_11, %c0_12, %c0_13] : memref<1x8x896xf32, #tpu.memory_space<vmem>>, vector<1x8x896xf32>
    %36 = vector.shape_cast %35 : vector<1x8x896xf32> to vector<8x896xf32>
    %37 = vector.shape_cast %31 : vector<8x896xf32> to vector<1x8x896xf32>
    tpu.vector_store %arg4[%c0_11, %c0_12, %c0_13], %37 {strides = array<i32>} : memref<1x8x896xf32, #tpu.memory_space<vmem>>, vector<1x8x896xf32>,
    %c0_14 = arith.constant 0 : index
    %c0_15 = arith.constant 0 : index
    %38 = vector.load %arg7[%c0_14, %c0_15] : memref<8x896xf32, #tpu.memory_space<vmem>>, vector<8x896xf32>
    tpu.vector_store %arg7[%c0_14, %c0_15], %29 {strides = array<i32>} : memref<8x896xf32, #tpu.memory_space<vmem>>, vector<8x896xf32>,
    %c0_16 = arith.constant 0 : index
    %c0_17 = arith.constant 0 : index
    %39 = vector.load %arg6[%c0_16, %c0_17] : memref<8x896xf32, #tpu.memory_space<vmem>>, vector<8x896xf32>
    tpu.vector_store %arg6[%c0_16, %c0_17], %31 {strides = array<i32>} : memref<8x896xf32, #tpu.memory_space<vmem>>, vector<8x896xf32>,
    return
  }
  func.func @transform_0(%arg0: i32) -> (i32, i32, i32) {
    %c0_i32 = arith.constant 0 : i32
    %c0_i32_0 = arith.constant 0 : i32
    %c0_i32_1 = arith.constant 0 : i32
    return %arg0, %c0_i32, %c0_i32_0 : i32, i32, i32
  }
  func.func @transform_1(%arg0: i32) -> (i32, i32) {
    %c0_i32 = arith.constant 0 : i32
    %c0_i32_0 = arith.constant 0 : i32
    %c0_i32_1 = arith.constant 0 : i32
    return %c0_i32, %c0_i32_0 : i32, i32
  }
  func.func @transform_2(%arg0: i32) -> (i32, i32) {
    %c0_i32 = arith.constant 0 : i32
    %c0_i32_0 = arith.constant 0 : i32
    %c0_i32_1 = arith.constant 0 : i32
    return %c0_i32, %c0_i32_0 : i32, i32
  }
  func.func @transform_3(%arg0: i32) -> (i32, i32, i32) {
    %c0_i32 = arith.constant 0 : i32
    %c0_i32_0 = arith.constant 0 : i32
    %c0_i32_1 = arith.constant 0 : i32
    return %arg0, %c0_i32, %c0_i32_0 : i32, i32, i32
  }
  func.func @transform_4(%arg0: i32) -> (i32, i32, i32) {
    %c0_i32 = arith.constant 0 : i32
    %c0_i32_0 = arith.constant 0 : i32
    %c0_i32_1 = arith.constant 0 : i32
    return %arg0, %c0_i32, %c0_i32_0 : i32, i32, i32
  }
}

</mosaic_0001>

<bundles_post_ra>
// kernel: tpu_custom_call.1
= control target key start
LH: loop header
LB: loop body
LE: loop exit
PB: predicated region body
PF: predicated region fallthrough
CT: control target
= control target key end

     0   :  { %10 = vsyncpa [#allocation6], 0  ;;  %s2679_s0 = inlined_call_operand.hbm [shape: f32[4,32,896], index: 0, kind: input, shape index: {}]   ;;  %s2680_s1 = inlined_call_operand.hbm [shape: bf16[32,72], index: 1, kind: input, shape index: {}]   ;;  %s2681_s2 = inlined_call_operand.hbm [shape: f32[72,896], index: 2, kind: input, shape index: {}]   ;;  %s2682_s3 = inlined_call_operand.hbm [shape: f32[4,8,896], index: 3, kind: output, shape index: {0}]   ;;  %s2683_s4 = inlined_call_operand.hbm [shape: f32[4,32,896], index: 4, kind: output, shape index: {1}]  }
   0x1   :  { %12 = vsyncpa [#allocation6 + $0x1], 0 }
   0x2   :  { %13 = vsyncpa [#allocation9], 0 }
   0x3   :  { %14 = vsyncpa [#allocation7], 0 }
   0x4   :  { %16 = vsyncpa [#allocation7 + $0x1], 0 }
   0x5   :  { %17 = vsyncpa [#allocation13], 0 }
   0x6   :  { %19 = vsyncpa [#allocation13 + $0x1], 0  ;;  %s1884_s15 = smov 0   ;;  %s1886_s16 = smov 0  }
   0x7   :  { %s1888_s17 = smov 0   ;;  %s1890_s18 = smov 0  }
   0x8 LB: > { %s1905_s19 = sadd.s32 4294967295, %s1836_s18   ;;  %s1383_s20 = sadd.s32 4294967294, %s1836_s18   ;;  %s1836_s18 = sphi %s1890_s18, %s2703_s18   ;;  %s1832_s17 = sphi %s1888_s17, %s2702_s17   ;;  %s1828_s16 = sphi %s1886_s16, %s2701_s16   ;;  %s1824_s15 = sphi %s1884_s15, %s2700_s15  }
   0x9   : > { %p45_p0 = scmp.ne.s32.totalorder %s1828_s16, %s1824_s15  ;;  %p2684_p1 = scmp.eq.s32.totalorder %s1905_s19, 0 }
   0xa   : > { %p117_p3 = scmp.eq.s32.totalorder %s1383_s20, 3  ;;  %p1384_p5 = scmp.ge.s32.totalorder %s1836_s18, 1 }
   0xb   : > { %p1914_p4 = por %p2684_p1, %p45_p0  ;;  %p150_p7 = scmp.lt.s32.totalorder %s1836_s18, 5 }
   0xc   : > { %p1919_p6 = por %p117_p3, %p45_p0  ;;  %s1838_s24 = smov [#allocation8]  }
   0xd   : > { %s2687_s21 = scalar_select %p1914_p4, 1, 0 }
   0xe   : > { %s2688_s22 = scalar_select %p1919_p6, 1, 0 }
   0xf   : > { %p1925_p9 = pnand %p1384_p5, %p150_p7  ;;  %s162_s25 = sshll.u32 %s1838_s24, 4  ;;  %s163_s25 = int_to_ptr.vmem [resolvable:$true] %s162_s25 }
  0x10   : > { %s1839_s27 = smov [#allocation10]   ;;  %s1648_s5 = scalar_lea.hbm %s2680_s1, 256 }
  0x11   : > { %s2689_s23 = scalar_select %p1925_p9, 1, 0 }
  0x12   : > { %p1474_p10 = pneg %p1925_p9  ;;  %s175_s28 = sshll.u32 %s1839_s27, 4  ;;  %s1937_s28 = int_to_ptr.vmem [resolvable:$true] %s175_s28 }
  0x13   : > { %p1649_p12 = scmp.ne.s32.totalorder %s2680_s1, %s1648_s5  ;;  %p1655_p5 = scmp.lt.u32.totalorder %s1648_s5, %s2680_s1 }
  0x14   : > { %p1933_p11 = pnand %p1474_p10, %p2684_p1 }
  0x16   : > { %p1650_p13 = pneg %p1933_p11 }
  0x18   : > { %p1651_p0 = pnand %p1650_p13, %p1649_p12 }
  0x1a   : > { %p1652_p3 = pneg %p1651_p0 }
  0x1c   : > { %p1657_p7 = pnand %p1655_p5, %p1652_p3 }
  0x1e   : > { %1660 = shalt.err (!%p1657_p7)
}
  0x1f   : > { %s1661_s10 = scalar_lea.vmem %s163_s25, 256  ;;  %p1669_p2 = scmp.lt.s32.totalorder %s163_s25, %s163_s25 }
  0x20   : > { %p1662_p10 = scmp.ne.s32.totalorder %s163_s25, %s1661_s10  ;;  %p1670_p6 = scmp.lt.s32.totalorder %s1661_s10, %s1661_s10 }
  0x22   : > { %p1664_p8 = pnand %p1662_p10, %p1650_p13  ;;  %p1671_p4 = por %p1670_p6, %p1669_p2 }
  0x24   : > { %p1665_p1 = pneg %p1664_p8 }
  0x26   : > { %p1672_p9 = pnand %p1671_p4, %p1665_p1 }
  0x28   : > { %1675 = shalt.err (!%p1672_p9)
}
  0x29   : > { %s1840_s11 = smov 64   ;;  %s1841_s12 = smov 4  }
  0x2a   : > { %1477 = dma.hbm_to_vmem [thread:$0]  (!%p1933_p11), %s2680_s1, 256, %s163_s25, [#allocation9], %s1840_s11, %s1840_s11, %s1841_s12  }
  0x2b   : > { %s1676_s27 = scalar_lea.hbm %s2681_s2, 8064 }
  0x2c   : > { %p1677_p8 = scmp.ne.s32.totalorder %s2681_s2, %s1676_s27  ;;  %p1683_p4 = scmp.lt.u32.totalorder %s1676_s27, %s2681_s2 }
  0x2e   : > { %p1679_p1 = pnand %p1677_p8, %p1650_p13 }
  0x30   : > { %p1680_p2 = pneg %p1679_p1 }
  0x32   : > { %p1685_p6 = pnand %p1683_p4, %p1680_p2 }
  0x34   : > { %1688 = shalt.err (!%p1685_p6)
}
  0x35   : > { %s1689_s25 = scalar_lea.vmem %s1937_s28, 8064  ;;  %p1697_p3 = scmp.lt.s32.totalorder %s1937_s28, %s1937_s28 }
  0x36   : > { %p1690_p9 = scmp.ne.s32.totalorder %s1937_s28, %s1689_s25  ;;  %p1698_p5 = scmp.lt.s32.totalorder %s1689_s25, %s1689_s25 }
  0x38   : > { %p1692_p12 = pnand %p1690_p9, %p1650_p13  ;;  %p1699_p7 = por %p1698_p5, %p1697_p3 }
  0x3a   : > { %p1693_p0 = pneg %p1692_p12 }
  0x3c   : > { %p1700_p10 = pnand %p1699_p7, %p1693_p0 }
  0x3e   : > { %1703 = shalt.err (!%p1700_p10)
}
  0x3f   : > { %s1842_s7 = smov 896   ;;  %s1843_s8 = smov 56  }
  0x40   : > { %1480 = dma.hbm_to_vmem [thread:$0]  (!%p1933_p11), %s2681_s2, 8064, %s1937_s28, [#allocation9], %s1842_s7, %s1842_s7, %s1843_s8  }
  0x41   : > { %s1990_s11 = sadd.s32 1, %s1836_s18   ;;  %s32_s13 = sadd.s32 1, %s1832_s17 }
  0x42   : > { %s29_s12 = ssub.s32 %s1836_s18, %s1990_s11  ;;  %p39_p8 = scmp.ne.s32.totalorder %s1832_s17, %s1828_s16 }
  0x43   : > { %p30_p13 = scmp.eq.s32.totalorder %s29_s12, 0  ;;  %p40_p1 = scmp.eq.s32.totalorder %s1836_s18, 0 }
  0x44   : > { %p2691_p4 = scmp.eq.s32.totalorder %s1905_s19, 3  ;;  %p1494_p9 = scmp.lt.s32.totalorder %s1836_s18, 4 }
  0x45   : > { %s1999_s14 = scalar_select %p30_p13, %s1832_s17, %s32_s13  }
  0x46   : > { %p41_p2 = por %p40_p1, %p39_p8  ;;  %p2003_p6 = por %p2691_p4, %p39_p8 }
  0x47   : > { %s189_s20 = sand.u32 1, %s1832_s17   ;;  %s1455_s28 = smul.u32 3584, %s1836_s18 }
  0x48   : > { %s1454_s24 = smul.u32 224, %s189_s20  ;;  %p2010_p11 = pnand %p1494_p9, %p41_p2 }
  0x49   : > { %s2017_s5 = scalar_lea.hbm %s2679_s0, %s1455_s28  ;;  %s2021_s9 = scalar_lea.sflag [#allocation6], %s189_s20 }
  0x4a   : > { %s193_s6 = scalar_lea.vmem [#allocation5], %s1454_s24  ;;  %s1704_s10 = scalar_lea.hbm %s2017_s5, 3584 }
  0x4b   : > { %s200_s25 = sshll.u32 %s193_s6, 4  ;;  %p1705_p12 = scmp.ne.s32.totalorder %s2017_s5, %s1704_s10  ;;  %s2019_s25 = int_to_ptr.vmem [resolvable:$true] %s200_s25 }
  0x4c   : > { %p1706_p0 = pneg %p2010_p11  ;;  %s1709_s28 = scalar_lea.hbm %s2679_s0, 14336 }
  0x4d   : > { %p1710_p7 = scmp.lt.u32.totalorder %s2017_s5, %s2679_s0  ;;  %p1711_p10 = scmp.lt.u32.totalorder %s1709_s28, %s1704_s10 }
  0x4e   : > { %p1707_p3 = pnand %p1706_p0, %p1705_p12  ;;  %p1713_p8 = scmp.lt.u32.totalorder %s1704_s10, %s2017_s5 }
  0x4f   : > { %p1712_p13 = por %p1711_p10, %p1710_p7 }
  0x50   : > { %p1708_p5 = pneg %p1707_p3 }
  0x51   : > { %p1714_p1 = por %p1713_p8, %p1712_p13 }
  0x53   : > { %p1715_p2 = pnand %p1714_p1, %p1708_p5 }
  0x55   : > { %1718 = shalt.err (!%p1715_p2)
}
  0x56   : > { %s1719_s20 = scalar_lea.vmem %s2019_s25, 3584  ;;  %s1844_s24 = smov [#allocation5]  }
  0x57   : > { %p1720_p4 = scmp.ne.s32.totalorder %s2019_s25, %s1719_s20  ;;  %s1724_s6 = sshll.u32 %s1844_s24, 4  ;;  %s1725_s6 = int_to_ptr.vmem [resolvable:$false] %s1724_s6 }
  0x58   : > { %s1726_s12 = scalar_lea.vmem %s1725_s6, 7168  ;;  %p1727_p3 = scmp.lt.s32.totalorder %s2019_s25, %s1725_s6 }
  0x59   : > { %p1722_p9 = pnand %p1720_p4, %p1706_p0  ;;  %p1728_p7 = scmp.lt.s32.totalorder %s1726_s12, %s1719_s20 }
  0x5b   : > { %p1723_p12 = pneg %p1722_p9  ;;  %p1729_p10 = por %p1728_p7, %p1727_p3 }
  0x5d   : > { %p1730_p13 = pnand %p1729_p10, %p1723_p12 }
  0x5f   : > { %1733 = shalt.err (!%p1730_p13)
}
  0x60   : > { %1484 = dma.hbm_to_vmem [thread:$0]  (!%p2010_p11), %s2017_s5, 3584, %s2019_s25, %s2021_s9, %s1842_s7, %s1842_s7, %s1843_s8  }
  0x61   : > { %p2694_p0 = scmp.ne.s32.totalorder %s2689_s23, 0 }
  0x62   : > { %s2055_s10 = sand.u32 (!%p2694_p0), 1, %s1828_s16   ;;  %p2695_p5 = scmp.ne.s32.totalorder (!%p2694_p0), %s2687_s21, 0 }
  0x63   : > { %212 = sbr.rel (%p2694_p0) target bundleno = 687 (0x2af), region = 32  ;;  %s215_s28 = scalar_lea.sflag (!%p2694_p0), [#allocation6], %s2055_s10 }
  0x64   : > { %s1456_s13 = smul.u32 (!%p2694_p0), 224, %s2055_s10 }
  0x66   : > { %s2059_s29 = scalar_lea.vmem (!%p2694_p0), [#allocation5], %s1456_s13 }
  0x6a   : > { %1807 = dma.done.wait (%p2695_p5), %s215_s28, 3584  }
  0x6b   : > { %1809 = vsyncadd (%p2695_p5), %s215_s28, 4294963712  ;;  %p2696_p11 = scmp.eq.s32.totalorder %s1905_s19, 0 }
  0x6d   : > { %1811 = dma.done.wait (%p2696_p11), [#allocation9], 8320   ;;  %p2697_p8 = pmov %p2696_p11 }
  0x6e   : > { %s1457_s23 = smul.u32 56, %s2055_s10  ;;  %s2072_s8 = scalar_lea.vmem [#allocation12], %s1456_s13 }
  0x6f   : > { %1813 = vsyncadd (%p2697_p8), [#allocation9], 4294958976  ;;  %p2698_p1 = scmp.ne.s32.totalorder %s1905_s19, 0 }
  0x70   : > { %s2070_s7 = scalar_lea.vmem [#allocation11], %s1457_s23  ;;  %v268_v0 = vld [vmem:[%s2059_s29] sm:$0xff] (!%p2698_p1)  ;;  %v269_v1 = vld [vmem:[%s2059_s29 + $0x8] sm:$0xff] (!%p2698_p1)  ;;  %v270_v2 = vld [vmem:[%s2059_s29 + $0x10] sm:$0xff] (!%p2698_p1)  ;;  %v1845_v3 = vmov (!%p2698_p1), 0.0  }
  0x71   : > { %260 = sbr.rel (%p2698_p1) target bundleno = 131 (0x83), region = 48  ;;  %261 = vst [vmem:[#allocation3] sm:$0xff] (!%p2698_p1), %v1845_v3  ;;  %262 = vst [vmem:[#allocation3 + $0x8] sm:$0xff] (!%p2698_p1), %v1845_v3  ;;  %v271_v4 = vld [vmem:[%s2059_s29 + $0x18] sm:$0xff] (!%p2698_p1)  ;;  %v272_v5 = vld [vmem:[%s2059_s29 + $0x20] sm:$0xff] (!%p2698_p1) }
  0x72   : > { %263 = vst [vmem:[#allocation3 + $0x10] sm:$0xff] (!%p2698_p1), %v1845_v3  ;;  %264 = vst [vmem:[#allocation3 + $0x18] sm:$0xff] (!%p2698_p1), %v1845_v3  ;;  %v273_v6 = vld [vmem:[%s2059_s29 + $0x28] sm:$0xff] (!%p2698_p1)  ;;  %v274_v7 = vld [vmem:[%s2059_s29 + $0x30] sm:$0xff] (!%p2698_p1) }
  0x73   : > { %265 = vst [vmem:[#allocation3 + $0x20] sm:$0xff] (!%p2698_p1), %v1845_v3  ;;  %266 = vst [vmem:[#allocation3 + $0x28] sm:$0xff] (!%p2698_p1), %v1845_v3  ;;  %v275_v8 = vld [vmem:[%s2059_s29 + $0x38] sm:$0xff] (!%p2698_p1)  ;;  %v276_v9 = vld [vmem:[%s2059_s29 + $0x40] sm:$0xff] (!%p2698_p1) }
  0x74   : > { %267 = vst [vmem:[#allocation3 + $0x30] sm:$0xff] (!%p2698_p1), %v1845_v3  ;;  %296 = vst [vmem:[#allocation4] sm:$0xff] (!%p2698_p1), %v268_v0  ;;  %v277_v10 = vld [vmem:[%s2059_s29 + $0x48] sm:$0xff] (!%p2698_p1)  ;;  %v278_v11 = vld [vmem:[%s2059_s29 + $0x50] sm:$0xff] (!%p2698_p1) }
  0x75   : > { %297 = vst [vmem:[#allocation4 + $0x8] sm:$0xff] (!%p2698_p1), %v269_v1  ;;  %298 = vst [vmem:[#allocation4 + $0x10] sm:$0xff] (!%p2698_p1), %v270_v2  ;;  %v279_v12 = vld [vmem:[%s2059_s29 + $0x58] sm:$0xff] (!%p2698_p1)  ;;  %v280_v13 = vld [vmem:[%s2059_s29 + $0x60] sm:$0xff] (!%p2698_p1) }
  0x76   : > { %299 = vst [vmem:[#allocation4 + $0x18] sm:$0xff] (!%p2698_p1), %v271_v4  ;;  %300 = vst [vmem:[#allocation4 + $0x20] sm:$0xff] (!%p2698_p1), %v272_v5  ;;  %v281_v14 = vld [vmem:[%s2059_s29 + $0x68] sm:$0xff] (!%p2698_p1)  ;;  %v282_v15 = vld [vmem:[%s2059_s29 + $0x70] sm:$0xff] (!%p2698_p1) }
  0x77   : > { %301 = vst [vmem:[#allocation4 + $0x28] sm:$0xff] (!%p2698_p1), %v273_v6  ;;  %302 = vst [vmem:[#allocation4 + $0x30] sm:$0xff] (!%p2698_p1), %v274_v7  ;;  %v283_v16 = vld [vmem:[%s2059_s29 + $0x78] sm:$0xff] (!%p2698_p1)  ;;  %v284_v17 = vld [vmem:[%s2059_s29 + $0x80] sm:$0xff] (!%p2698_p1) }
  0x78   : > { %303 = vst [vmem:[#allocation4 + $0x38] sm:$0xff] %v275_v8  ;;  %304 = vst [vmem:[#allocation4 + $0x40] sm:$0xff] %v276_v9  ;;  %v285_v18 = vld [vmem:[%s2059_s29 + $0x88] sm:$0xff]  ;;  %v286_v19 = vld [vmem:[%s2059_s29 + $0x90] sm:$0xff] }
  0x79   : > { %305 = vst [vmem:[#allocation4 + $0x48] sm:$0xff] %v277_v10  ;;  %306 = vst [vmem:[#allocation4 + $0x50] sm:$0xff] %v278_v11  ;;  %v287_v20 = vld [vmem:[%s2059_s29 + $0x98] sm:$0xff]  ;;  %v288_v21 = vld [vmem:[%s2059_s29 + $0xa0] sm:$0xff] }
  0x7a   : > { %307 = vst [vmem:[#allocation4 + $0x58] sm:$0xff] %v279_v12  ;;  %308 = vst [vmem:[#allocation4 + $0x60] sm:$0xff] %v280_v13  ;;  %v289_v22 = vld [vmem:[%s2059_s29 + $0xa8] sm:$0xff]  ;;  %v290_v23 = vld [vmem:[%s2059_s29 + $0xb0] sm:$0xff] }
  0x7b   : > { %309 = vst [vmem:[#allocation4 + $0x68] sm:$0xff] %v281_v14  ;;  %310 = vst [vmem:[#allocation4 + $0x70] sm:$0xff] %v282_v15  ;;  %v291_v24 = vld [vmem:[%s2059_s29 + $0xb8] sm:$0xff]  ;;  %v292_v25 = vld [vmem:[%s2059_s29 + $0xc0] sm:$0xff] }
  0x7c   : > { %311 = vst [vmem:[#allocation4 + $0x78] sm:$0xff] %v283_v16  ;;  %312 = vst [vmem:[#allocation4 + $0x80] sm:$0xff] %v284_v17  ;;  %v293_v26 = vld [vmem:[%s2059_s29 + $0xc8] sm:$0xff]  ;;  %v294_v27 = vld [vmem:[%s2059_s29 + $0xd0] sm:$0xff] }
  0x7d   : > { %313 = vst [vmem:[#allocation4 + $0x88] sm:$0xff] %v285_v18  ;;  %314 = vst [vmem:[#allocation4 + $0x90] sm:$0xff] %v286_v19  ;;  %v295_v28 = vld [vmem:[%s2059_s29 + $0xd8] sm:$0xff] }
  0x7e   : > { %315 = vst [vmem:[#allocation4 + $0x98] sm:$0xff] %v287_v20  ;;  %316 = vst [vmem:[#allocation4 + $0xa0] sm:$0xff] %v288_v21 }
  0x7f   : > { %317 = vst [vmem:[#allocation4 + $0xa8] sm:$0xff] %v289_v22  ;;  %318 = vst [vmem:[#allocation4 + $0xb0] sm:$0xff] %v290_v23 }
  0x80   : > { %319 = vst [vmem:[#allocation4 + $0xb8] sm:$0xff] %v291_v24  ;;  %320 = vst [vmem:[#allocation4 + $0xc0] sm:$0xff] %v292_v25 }
  0x81   : > { %321 = vst [vmem:[#allocation4 + $0xc8] sm:$0xff] %v293_v26  ;;  %322 = vst [vmem:[#allocation4 + $0xd0] sm:$0xff] %v294_v27 }
  0x82   : > { %323 = vst [vmem:[#allocation4 + $0xd8] sm:$0xff] %v295_v28 }
  0x83 PF: > { %p1393_p2 = scmp.le.s32.totalorder %s1905_s19, 0 }
  0x84   : > { %v2105_v29 = vld [vmem:[#allocation2] sm:$0xff] (!%p1393_p2)  ;;  %s1846_s21 = smov (!%p1393_p2), 8   ;;  %s1847_s27 = smov (!%p1393_p2), 9   ;;  %v2111_v30 = vld [vmem:[#allocation2 + $0x8] sm:$0xff] (!%p1393_p2)  ;;  %v2117_v31 = vld [vmem:[#allocation2 + $0x30] sm:$0xff] (!%p1393_p2)  ;;  %v1854_v36 = vmov (!%p1393_p2), 0   ;;  %v349_v37 = vlaneseq (!%p1393_p2) }
  0x85   : > { %327 = sbr.rel (%p1393_p2) target bundleno = 591 (0x24f), region = 52  ;;  %359 = vrot.lane.b32.xlu1 (!%p1393_p2), %v2105_v29, %s1846_s21  ;;  %335 = vrot.lane.b32.xlu0 (!%p1393_p2), %v2105_v29, %s1847_s27  ;;  %s1848_s5 = smov (!%p1393_p2), 7   ;;  %v2135_v32 = vld [vmem:[#allocation2 + $0x18] sm:$0xff] (!%p1393_p2)  ;;  %v2137_v33 = vld [vmem:[#allocation2 + $0x10] sm:$0xff] (!%p1393_p2)  ;;  %v2175_v34 = vld [vmem:[#allocation2 + $0x20] sm:$0xff] (!%p1393_p2)  ;;  %vm723_vm8 = vcmask (!%p1393_p2), 1043456  }
  0x86   : > { %s1849_s25 = smov (!%p1393_p2), 1   ;;  %s1850_s9 = smov (!%p1393_p2), 127   ;;  %v2182_v35 = vld [vmem:[#allocation2 + $0x28] sm:$0xff] (!%p1393_p2)  ;;  %777 = vmatprep.mubr.bf16.mxu0 (!%p1393_p2), %v1854_v36  ;;  %830 = vmatprep.mubr.bf16.mxu1 (!%p1393_p2), %v1854_v36  ;;  %v2226_v38 = vand.u32 (!%p1393_p2), 127, %v349_v37  ;;  %v521_v42 = vld [vmem:[#allocation10 + $0x40] sm:$0xff] (!%p1393_p2)  ;;  %v520_v49 = vld [vmem:[#allocation10 + $0x38] sm:$0xff] (!%p1393_p2) }
  0x87   : > { %s1851_s30 = smov (!%p1393_p2), 121   ;;  %s1852_s20 = smov (!%p1393_p2), 120   ;;  %v514_v41 = vld [vmem:[#allocation10 + $0x8] sm:$0xff] (!%p1393_p2)  ;;  %v513_v50 = vld [vmem:[#allocation10] sm:$0xff] (!%p1393_p2)  ;;  %v528_v61 = vld [vmem:[#allocation10 + $0x78] sm:$0xff] (!%p1393_p2)  ;;  %vm716_vm9 = vcmask (!%p1393_p2), 588800  }
  0x88   : > { %s1853_s24 = smov (!%p1393_p2), 119   ;;  %vm373_vm0 = vcmp.lt.s32.totalorder (!%p1393_p2), %v2226_v38, 8  ;;  %vm351_vm1 = vcmp.lt.s32.totalorder (!%p1393_p2), %v2226_v38, 9  ;;  %vm395_vm2 = vcmp.lt.s32.totalorder (!%p1393_p2), %v2226_v38, 7  ;;  %vm417_vm3 = vcmp.lt.s32.totalorder (!%p1393_p2), %v2226_v38, 1  ;;  %v535_v63 = vld [vmem:[#allocation10 + $0xb0] sm:$0xff] (!%p1393_p2) }
  0x89   : > { %361 = vrot.lane.b32.xlu1 (!%p1393_p2), %v2111_v30, %s1846_s21  ;;  %337 = vrot.lane.b32.xlu0 (!%p1393_p2), %v2111_v30, %s1847_s27  ;;  %v534_v5 = vld [vmem:[#allocation10 + $0xa8] sm:$0xff] (!%p1393_p2)  ;;  %v527_v6 = vld [vmem:[#allocation10 + $0x70] sm:$0xff] (!%p1393_p2)  ;;  %v516_v21 = vld [vmem:[#allocation10 + $0x18] sm:$0xff] (!%p1393_p2)  ;;  %vm439_vm4 = vcmp.lt.s32.totalorder (!%p1393_p2), %v2226_v38, 127  ;;  %vm461_vm5 = vcmp.lt.s32.totalorder (!%p1393_p2), %v2226_v38, 121  ;;  %vm483_vm6 = vcmp.lt.s32.totalorder (!%p1393_p2), %v2226_v38, 120 }
  0x8a   : > { %v515_v17 = vld [vmem:[#allocation10 + $0x10] sm:$0xff] (!%p1393_p2)  ;;  %v522_v20 = vld [vmem:[#allocation10 + $0x48] sm:$0xff] (!%p1393_p2)  ;;  %vm505_vm7 = vcmp.lt.s32.totalorder (!%p1393_p2), %v2226_v38, 119 }
  0x8b   : > { %v523_v22 = vld [vmem:[#allocation10 + $0x50] sm:$0xff] (!%p1393_p2)  ;;  %v542_v27 = vld [vmem:[#allocation10 + $0xe8] sm:$0xff] (!%p1393_p2) }
  0x8d   : > { %371 = vrot.lane.b32.xlu1 %v2117_v31, %s1846_s21  ;;  %347 = vrot.lane.b32.xlu0 %v2117_v31, %s1847_s27 }
  0x91   : > { %383 = vrot.lane.b32.xlu1 %v2111_v30, %s1848_s5  ;;  %381 = vrot.lane.b32.xlu0 %v2105_v29, %s1848_s5 }
  0x95   : > { %405 = vrot.lane.b32.xlu1 %v2111_v30, %s1849_s25  ;;  %403 = vrot.lane.b32.xlu0 %v2105_v29, %s1849_s25 }
  0x99   : > { %415 = vrot.lane.b32.xlu1 %v2117_v31, %s1849_s25  ;;  %393 = vrot.lane.b32.xlu0 %v2117_v31, %s1848_s5 }
  0x9d   : > { %341 = vrot.lane.b32.xlu1 %v2135_v32, %s1847_s27  ;;  %339 = vrot.lane.b32.xlu0 %v2137_v33, %s1847_s27 }
  0xa1   : > { %365 = vrot.lane.b32.xlu1 %v2135_v32, %s1846_s21  ;;  %363 = vrot.lane.b32.xlu0 %v2137_v33, %s1846_s21 }
  0xa5   : > { %429 = vrot.lane.b32.xlu1 %v2137_v33, %s1850_s9  ;;  %427 = vrot.lane.b32.xlu0 %v2111_v30, %s1850_s9 }
  0xa9   : > { %385 = vrot.lane.b32.xlu1 %v2137_v33, %s1848_s5  ;;  %425 = vrot.lane.b32.xlu0 %v2105_v29, %s1850_s9 }
  0xad   : > { %407 = vrot.lane.b32.xlu1 %v2137_v33, %s1849_s25  ;;  %387 = vrot.lane.b32.xlu0 %v2135_v32, %s1848_s5 }
  0xb1   : > { %449 = vrot.lane.b32.xlu1 %v2111_v30, %s1851_s30  ;;  %409 = vrot.lane.b32.xlu0 %v2135_v32, %s1849_s25 }
  0xb5   : > { %471 = vrot.lane.b32.xlu1 %v2111_v30, %s1852_s20  ;;  %451 = vrot.lane.b32.xlu0 %v2137_v33, %s1851_s30 }
  0xb9   : > { %447 = vrot.lane.b32.xlu1 %v2105_v29, %s1851_s30  ;;  %473 = vrot.lane.b32.xlu0 %v2137_v33, %s1852_s20 }
  0xbd   : > { %431 = vrot.lane.b32.xlu1 %v2135_v32, %s1850_s9  ;;  %469 = vrot.lane.b32.xlu0 %v2105_v29, %s1852_s20 }
  0xc1   : > { %491 = vrot.lane.b32.xlu1 %v2105_v29, %s1853_s24  ;;  %433 = vrot.lane.b32.xlu0 %v2175_v34, %s1850_s9 }
  0xc5   : > { %495 = vrot.lane.b32.xlu1 %v2137_v33, %s1853_s24  ;;  %493 = vrot.lane.b32.xlu0 %v2111_v30, %s1853_s24 }
  0xc9   : > { %345 = vrot.lane.b32.xlu1 %v2182_v35, %s1847_s27  ;;  %343 = vrot.lane.b32.xlu0 %v2175_v34, %s1847_s27 }
  0xcd   : > { %369 = vrot.lane.b32.xlu1 %v2182_v35, %s1846_s21  ;;  %367 = vrot.lane.b32.xlu0 %v2175_v34, %s1846_s21 }
  0xd1   : > { %455 = vrot.lane.b32.xlu1 %v2175_v34, %s1851_s30  ;;  %453 = vrot.lane.b32.xlu0 %v2135_v32, %s1851_s30 }
  0xd5   : > { %477 = vrot.lane.b32.xlu1 %v2175_v34, %s1852_s20  ;;  %475 = vrot.lane.b32.xlu0 %v2135_v32, %s1852_s20 }
  0xd9   : > { %391 = vrot.lane.b32.xlu1 %v2182_v35, %s1848_s5  ;;  %389 = vrot.lane.b32.xlu0 %v2175_v34, %s1848_s5 }
  0xdd   : > { %413 = vrot.lane.b32.xlu1 %v2182_v35, %s1849_s25  ;;  %411 = vrot.lane.b32.xlu0 %v2175_v34, %s1849_s25 }
  0xe1   : > { %499 = vrot.lane.b32.xlu1 %v2175_v34, %s1853_s24  ;;  %497 = vrot.lane.b32.xlu0 %v2135_v32, %s1853_s24 }
  0xe5   : > { %437 = vrot.lane.b32.xlu1 %v2117_v31, %s1850_s9  ;;  %435 = vrot.lane.b32.xlu0 %v2182_v35, %s1850_s9 }
  0xe9   : > { %459 = vrot.lane.b32.xlu1 %v2117_v31, %s1851_s30  ;;  %457 = vrot.lane.b32.xlu0 %v2182_v35, %s1851_s30 }
  0xed   : > { %481 = vrot.lane.b32.xlu1 %v2117_v31, %s1852_s20  ;;  %479 = vrot.lane.b32.xlu0 %v2182_v35, %s1852_s20 }
  0xf1   : > { %503 = vrot.lane.b32.xlu1 %v2117_v31, %s1853_s24  ;;  %501 = vrot.lane.b32.xlu0 %v2182_v35, %s1853_s24 }
  0xf7   : > { %v360_v39 = vpop.permute.xlu1 %359  ;;  %v336_v40 = vpop.permute.xlu0 %335 }
  0xfb   : > { %v362_v43 = vpop.permute.xlu1 %361  ;;  %v338_v44 = vpop.permute.xlu0 %337 }
  0xfc   : > { %v379_v45 = vsel %vm373_vm0, %v360_v39, %v362_v43  ;;  %v357_v46 = vsel %vm351_vm1, %v336_v40, %v338_v44 }
  0xfd   : > { %v577_v47 = vmul.f32 %v514_v41, %v357_v46  ;;  %v584_v48 = vmul.f32 %v521_v42, %v379_v45  ;;  %v549_v41 = vld [vmem:[#allocation10 + $0x120] sm:$0xff] }
  0xff   : > { %v2234_v51 = vpop.permute.xlu1 %371  ;;  %v2236_v52 = vpop.permute.xlu0 %347  ;;  %v640_v53 = vpack.c.bf16 %v584_v48, %v577_v47  ;;  %v605_v47 = vmul.f32 %v542_v27, %v2111_v30 }
 0x100   : > { %v380_v54 = vsel %vm373_vm0, %v2234_v51, %v360_v39  ;;  %v358_v55 = vsel %vm351_vm1, %v2236_v52, %v336_v40 }
 0x101   : > { %v583_v56 = vmul.f32 %v520_v49, %v380_v54  ;;  %v576_v57 = vmul.f32 %v513_v50, %v358_v55  ;;  %745 = vmatprep.subr.bf16.mxu0 %v640_v53  ;;  %v548_v50 = vld [vmem:[#allocation10 + $0x118] sm:$0xff] }
 0x103   : > { %v2244_v58 = vpop.permute.xlu1 %383  ;;  %v382_v59 = vpop.permute.xlu0 %381  ;;  %v639_v60 = vpack.c.bf16 %v583_v56, %v576_v57 }
 0x104   : > { %v401_v62 = vsel %vm395_vm2, %v382_v59, %v2244_v58 }
 0x105   : > { %746 = vmatpush1.bf16.msra.mxu0 %v639_v60  ;;  %v591_v3 = vmul.f32 %v528_v61, %v401_v62  ;;  %v536_v62 = vld [vmem:[#allocation10 + $0xb8] sm:$0xff] }
 0x107   : > { %v406_v0 = vpop.permute.xlu1 %405  ;;  %v404_v1 = vpop.permute.xlu0 %403 }
 0x108   : > { %v423_v2 = vsel %vm417_vm3, %v404_v1, %v406_v0 }
 0x109   : > { %v598_v4 = vmul.f32 %v535_v63, %v423_v2  ;;  %v537_v2 = vld [vmem:[#allocation10 + $0xc0] sm:$0xff] }
 0x10b   : > { %v2253_v7 = vpop.permute.xlu1 %415  ;;  %v2255_v8 = vpop.permute.xlu0 %393  ;;  %v647_v9 = vpack.c.bf16 %v598_v4, %v591_v3  ;;  %v529_v3 = vld [vmem:[#allocation10 + $0x80] sm:$0xff] }
 0x10c   : > { %v424_v10 = vsel %vm417_vm3, %v2253_v7, %v404_v1  ;;  %v402_v11 = vsel %vm395_vm2, %v2255_v8, %v382_v59  ;;  %v530_v1 = vld [vmem:[#allocation10 + $0x88] sm:$0xff] }
 0x10d   : > { %v597_v12 = vmul.f32 %v534_v5, %v424_v10  ;;  %v590_v13 = vmul.f32 %v527_v6, %v402_v11  ;;  %747 = vmatprep.subr.bf16.mxu0 %v647_v9 }
 0x10f   : > { %v2263_v14 = vpop.permute.xlu1 %341  ;;  %v340_v15 = vpop.permute.xlu0 %339  ;;  %v646_v16 = vpack.c.bf16 %v597_v12, %v590_v13 }
 0x110   : > { %v355_v18 = vsel %vm351_vm1, %v340_v15, %v2263_v14  ;;  %v356_v19 = vsel %vm351_vm1, %v338_v44, %v340_v15 }
 0x111   : > { %748 = vmatpush1.bf16.msra.mxu0 %v646_v16  ;;  %v578_v28 = vmul.f32 %v515_v17, %v356_v19  ;;  %v579_v39 = vmul.f32 %v516_v21, %v355_v18  ;;  %v563_v19 = vld [vmem:[#allocation10 + $0x190] sm:$0xff] }
 0x113   : > { %v2270_v23 = vpop.permute.xlu1 %365  ;;  %v364_v24 = vpop.permute.xlu0 %363 }
 0x114   : > { %v377_v25 = vsel %vm373_vm0, %v364_v24, %v2270_v23  ;;  %v378_v26 = vsel %vm373_vm0, %v362_v43, %v364_v24  ;;  %v541_v43 = vld [vmem:[#allocation10 + $0xe0] sm:$0xff] }
 0x115   : > { %v585_v37 = vmul.f32 %v522_v20, %v378_v26  ;;  %v586_v40 = vmul.f32 %v523_v22, %v377_v25  ;;  %v604_v56 = vmul.f32 %v541_v43, %v2105_v29  ;;  %v555_v26 = vld [vmem:[#allocation10 + $0x150] sm:$0xff] }
 0x116   : > { %v543_v43 = vld [vmem:[#allocation10 + $0xf0] sm:$0xff] }
 0x117   : > { %v2278_v42 = vpop.permute.xlu1 %429  ;;  %v428_v44 = vpop.permute.xlu0 %427  ;;  %v642_v45 = vpack.c.bf16 %v586_v40, %v579_v39  ;;  %v641_v46 = vpack.c.bf16 %v585_v37, %v578_v28  ;;  %v562_v28 = vld [vmem:[#allocation10 + $0x188] sm:$0xff] }
 0x118   : > { %v444_v48 = vsel %vm439_vm4, %v428_v44, %v2278_v42 }
 0x119   : > { %v612_v49 = vmul.f32 %v549_v41, %v444_v48  ;;  %798 = vmatprep.subr.bf16.mxu1 %v642_v45 }
 0x11a   : > { %799 = vmatpush1.bf16.msra.mxu1 %v641_v46  ;;  %v550_v46 = vld [vmem:[#allocation10 + $0x128] sm:$0xff] }
 0x11b   : > { %v386_v53 = vpop.permute.xlu1 %385  ;;  %v2284_v54 = vpop.permute.xlu0 %425  ;;  %v654_v55 = vpack.c.bf16 %v612_v49, %v605_v47  ;;  %v551_v49 = vld [vmem:[#allocation10 + $0x130] sm:$0xff] }
 0x11c   : > { %v445_v57 = vsel %vm439_vm4, %v2284_v54, %v428_v44  ;;  %v400_v4 = vsel %vm395_vm2, %v2244_v58, %v386_v53  ;;  %v556_v58 = vld [vmem:[#allocation10 + $0x158] sm:$0xff] }
 0x11d   : > { %v611_v30 = vmul.f32 %v548_v50, %v445_v57  ;;  %749 = vmatprep.subr.bf16.mxu0 %v654_v55  ;;  %v592_v12 = vmul.f32 %v529_v3, %v400_v4  ;;  %v544_v44 = vld [vmem:[#allocation10 + $0xf8] sm:$0xff] }
 0x11f   : > { %v408_v59 = vpop.permute.xlu1 %407  ;;  %v2290_v60 = vpop.permute.xlu0 %387  ;;  %v653_v61 = vpack.c.bf16 %v611_v30, %v604_v56  ;;  %v607_v56 = vmul.f32 %v544_v44, %v2135_v32 }
 0x120   : > { %v422_v63 = vsel %vm417_vm3, %v406_v0, %v408_v59  ;;  %v399_v29 = vsel %vm395_vm2, %v386_v53, %v2290_v60 }
 0x121   : > { %750 = vmatpush1.bf16.msra.mxu0 %v653_v61  ;;  %v599_v9 = vmul.f32 %v536_v62, %v422_v63  ;;  %v593_v10 = vmul.f32 %v530_v1, %v399_v29  ;;  %v570_v62 = vld [vmem:[#allocation10 + $0x1c8] sm:$0xff] }
 0x123   : > { %v450_v5 = vpop.permute.xlu1 %449  ;;  %v2300_v6 = vpop.permute.xlu0 %409  ;;  %v648_v17 = vpack.c.bf16 %v599_v9, %v592_v12 }
 0x124   : > { %v421_v0 = vsel %vm417_vm3, %v408_v59, %v2300_v6  ;;  %v606_v59 = vmul.f32 %v543_v43, %v2137_v33 }
 0x125   : > { %v600_v11 = vmul.f32 %v537_v2, %v421_v0 }
 0x127   : > { %v472_v13 = vpop.permute.xlu1 %471  ;;  %v2306_v15 = vpop.permute.xlu0 %451  ;;  %v649_v16 = vpack.c.bf16 %v600_v11, %v593_v10  ;;  %v519_v11 = vld [vmem:[#allocation10 + $0x30] sm:$0xff] }
 0x128   : > { %v466_v18 = vsel %vm461_vm5, %v450_v5, %v2306_v15 }
 0x129   : > { %800 = vmatprep.subr.bf16.mxu1 %v649_v16  ;;  %v619_v24 = vmul.f32 %v556_v58, %v466_v18  ;;  %v518_v16 = vld [vmem:[#allocation10 + $0x28] sm:$0xff]  ;;  %v2356_v18 = vld [vmem:[#allocation8] sm:$0xff]  }
 0x12a   : > { %801 = vmatpush1.bf16.msra.mxu1 %v648_v17 }
 0x12b   : > { %v2312_v20 = vpop.permute.xlu1 %447  ;;  %v2314_v21 = vpop.permute.xlu0 %473 }
 0x12c   : > { %v488_v22 = vsel %vm483_vm6, %v472_v13, %v2314_v21  ;;  %v467_v27 = vsel %vm461_vm5, %v2312_v20, %v450_v5 }
 0x12d   : > { %v626_v25 = vmul.f32 %v563_v19, %v488_v22  ;;  %v618_v45 = vmul.f32 %v555_v26, %v467_v27  ;;  %v526_v22 = vld [vmem:[#allocation10 + $0x68] sm:$0xff] }
 0x12f   : > { %v432_v37 = vpop.permute.xlu1 %431  ;;  %v2322_v39 = vpop.permute.xlu0 %469  ;;  %v661_v40 = vpack.c.bf16 %v626_v25, %v619_v24  ;;  %v524_v24 = vld [vmem:[#allocation10 + $0x58] sm:$0xff]  ;;  %v525_v25 = vld [vmem:[#allocation10 + $0x60] sm:$0xff] }
 0x130   : > { %v489_v41 = vsel %vm483_vm6, %v2322_v39, %v472_v13  ;;  %v443_v47 = vsel %vm439_vm4, %v2278_v42, %v432_v37  ;;  %v569_v42 = vld [vmem:[#allocation10 + $0x1c0] sm:$0xff] }
 0x131   : > { %v625_v48 = vmul.f32 %v562_v28, %v489_v41  ;;  %751 = vmatprep.subr.bf16.mxu0 %v661_v40  ;;  %v613_v57 = vmul.f32 %v550_v46, %v443_v47  ;;  %v517_v13 = vld [vmem:[#allocation10 + $0x20] sm:$0xff] }
 0x133   : > { %v2330_v50 = vpop.permute.xlu1 %491  ;;  %v2332_v53 = vpop.permute.xlu0 %433  ;;  %v660_v55 = vpack.c.bf16 %v625_v48, %v618_v45  ;;  %v655_v3 = vpack.c.bf16 %v613_v57, %v606_v59  ;;  %v564_v59 = vld [vmem:[#allocation10 + $0x198] sm:$0xff] }
 0x134   : > { %v442_v30 = vsel %vm439_vm4, %v432_v37, %v2332_v53 }
 0x135   : > { %v614_v61 = vmul.f32 %v551_v49, %v442_v30  ;;  %752 = vmatpush1.bf16.msra.mxu0 %v660_v55  ;;  %v557_v55 = vld [vmem:[#allocation10 + $0x160] sm:$0xff] }
 0x137   : > { %v2340_v63 = vpop.permute.xlu1 %495  ;;  %v494_v1 = vpop.permute.xlu0 %493  ;;  %v656_v29 = vpack.c.bf16 %v614_v61, %v607_v56  ;;  %v2375_v56 = vld [vmem:[#allocation8 + $0x8] sm:$0xff]   ;;  %v565_v61 = vld [vmem:[#allocation10 + $0x1a0] sm:$0xff] }
 0x138   : > { %v510_v32 = vsel %vm505_vm7, %v494_v1, %v2340_v63  ;;  %v511_v2 = vsel %vm505_vm7, %v2330_v50, %v494_v1 }
 0x139   : > { %v632_v33 = vmul.f32 %v569_v42, %v511_v2  ;;  %v633_v4 = vmul.f32 %v570_v62, %v510_v32  ;;  %802 = vmatprep.subr.bf16.mxu1 %v656_v29 }
 0x13a   : > { %803 = vmatpush1.bf16.msra.mxu1 %v655_v3 }
 0x13b   : > { %v667_v5 = vpack.c.bf16 %v632_v33, %v632_v33  ;;  %v668_v9 = vpack.c.bf16 %v633_v4, %v633_v4  ;;  %v346_v0 = vpop.permute.xlu1 %345  ;;  %v344_v10 = vpop.permute.xlu0 %343 }
 0x13c   : > { %v352_v12 = vsel %vm351_vm1, %v346_v0, %v2236_v52  ;;  %v354_v17 = vsel %vm351_vm1, %v2263_v14, %v344_v10  ;;  %v353_v19 = vsel %vm351_vm1, %v344_v10, %v346_v0  ;;  %v531_v0 = vld [vmem:[#allocation10 + $0x90] sm:$0xff]  ;;  %v532_v10 = vld [vmem:[#allocation10 + $0x98] sm:$0xff] }
 0x13d   : > { %1396 = vmatprep.subr.msk.bf16.mxu0 %vm723_vm8, %v668_v9  ;;  %v725_v58 = vsel %vm723_vm8, %v667_v5, 0  ;;  %v582_v52 = vmul.f32 %v519_v11, %v352_v12  ;;  %v580_v28 = vmul.f32 %v517_v13, %v354_v17  ;;  %v581_v41 = vmul.f32 %v518_v16, %v353_v19  ;;  %v538_v12 = vld [vmem:[#allocation10 + $0xc8] sm:$0xff]  ;;  %v539_v13 = vld [vmem:[#allocation10 + $0xd0] sm:$0xff] }
 0x13e   : > { %754 = vmatpush1.bf16.msra.mxu0 %v725_v58 }
 0x13f   : > { %v370_v26 = vpop.permute.xlu1 %369  ;;  %v368_v27 = vpop.permute.xlu0 %367 }
 0x140   : > { %v374_v14 = vsel %vm373_vm0, %v370_v26, %v2234_v51  ;;  %v375_v37 = vsel %vm373_vm0, %v368_v27, %v370_v26  ;;  %v376_v40 = vsel %vm373_vm0, %v2270_v23, %v368_v27  ;;  %v558_v23 = vld [vmem:[#allocation10 + $0x168] sm:$0xff]  ;;  %v571_v26 = vld [vmem:[#allocation10 + $0x1d0] sm:$0xff]  ;;  %v572_v27 = vld [vmem:[#allocation10 + $0x1d8] sm:$0xff] }
 0x141   : > { %v589_v44 = vmul.f32 %v526_v22, %v374_v14  ;;  %v587_v45 = vmul.f32 %v524_v24, %v376_v40  ;;  %v588_v46 = vmul.f32 %v525_v25, %v375_v37  ;;  %1397 = vmatmul.mubr.msk.bf16.vlgmr.msra.gmra.mrb[0].mxu0 %vm716_vm9, %v2356_v18 }
 0x142   : > { %787 = vmatprep.mubr.bf16.mxu0 %v1854_v36 }
 0x143   : > { %v643_v47 = vpack.c.bf16 %v587_v45, %v580_v28  ;;  %v2371_v48 = vpop.permute.xlu1 %455  ;;  %v454_v51 = vpop.permute.xlu0 %453  ;;  %v644_v43 = vpack.c.bf16 %v588_v46, %v581_v41  ;;  %v2373_v49 = vpack.c.bf16 %v589_v44, %v582_v52  ;;  %v546_v44 = vld [vmem:[#allocation10 + $0x108] sm:$0xff] }
 0x144   : > { %v464_v57 = vsel %vm461_vm5, %v454_v51, %v2371_v48  ;;  %v465_v30 = vsel %vm461_vm5, %v2306_v15, %v454_v51 }
 0x145   : > { %851 = vmatprep.subr.bf16.mxu0 %v644_v43  ;;  %v620_v32 = vmul.f32 %v557_v55, %v465_v30  ;;  %v621_v2 = vmul.f32 %v558_v23, %v464_v57  ;;  %v552_v43 = vld [vmem:[#allocation10 + $0x138] sm:$0xff]  ;;  %v553_v55 = vld [vmem:[#allocation10 + $0x140] sm:$0xff] }
 0x146   : > { %852 = vmatpush1.bf16.msra.mxu0 %v643_v47  ;;  %v540_v47 = vld [vmem:[#allocation10 + $0xd8] sm:$0xff] }
 0x147   : > { %v2383_v42 = vpop.permute.xlu1 %477  ;;  %v476_v62 = vpop.permute.xlu0 %475 }
 0x148   : > { %v486_v1 = vsel %vm483_vm6, %v476_v62, %v2383_v42  ;;  %v487_v29 = vsel %vm483_vm6, %v2314_v21, %v476_v62  ;;  %v547_v62 = vld [vmem:[#allocation10 + $0x110] sm:$0xff] }
 0x149   : > { %v627_v3 = vmul.f32 %v564_v59, %v487_v29  ;;  %v628_v33 = vmul.f32 %v565_v61, %v486_v1  ;;  %1398 = vmatmul.mubr.msk.bf16.gmra.mrb[4].mxu0 %vm716_vm9, %v2375_v56  ;;  %v533_v1 = vld [vmem:[#allocation10 + $0xa0] sm:$0xff] }
 0x14a   : > { %883 = vmatprep.mubr.bf16.mxu0 %v1854_v36 }
 0x14b   : > { %v392_v15 = vpop.permute.xlu1 %391  ;;  %v390_v4 = vpop.permute.xlu0 %389  ;;  %v663_v5 = vpack.c.bf16 %v628_v33, %v621_v2  ;;  %v662_v9 = vpack.c.bf16 %v627_v3, %v620_v32  ;;  %v554_v32 = vld [vmem:[#allocation10 + $0x148] sm:$0xff] }
 0x14c   : > { %v397_v11 = vsel %vm395_vm2, %v390_v4, %v392_v15  ;;  %v398_v21 = vsel %vm395_vm2, %v2290_v60, %v390_v4  ;;  %v396_v29 = vsel %vm395_vm2, %v392_v15, %v2255_v8  ;;  %v610_v8 = vmul.f32 %v547_v62, %v2117_v31 }
 0x14d   : > { %804 = vmatprep.subr.bf16.mxu1 %v663_v5  ;;  %v594_v22 = vmul.f32 %v531_v0, %v398_v21  ;;  %v595_v24 = vmul.f32 %v532_v10, %v397_v11  ;;  %v596_v15 = vmul.f32 %v533_v1, %v396_v29  ;;  %v559_v11 = vld [vmem:[#allocation10 + $0x170] sm:$0xff]  ;;  %v685_v1 = vld [vmem:[%s2059_s29 + $0x38] sm:$0xff] }
 0x14e   : > { %805 = vmatpush1.bf16.msra.mxu1 %v662_v9 }
 0x14f   : > { %v414_v16 = vpop.permute.xlu1 %413  ;;  %v412_v17 = vpop.permute.xlu0 %411 }
 0x150   : > { %v419_v58 = vsel %vm417_vm3, %v412_v17, %v414_v16  ;;  %v420_v19 = vsel %vm417_vm3, %v2300_v6, %v412_v17  ;;  %v545_v6 = vld [vmem:[#allocation10 + $0x100] sm:$0xff]  ;;  %v418_v51 = vsel %vm417_vm3, %v414_v16, %v2253_v7  ;;  %v566_v16 = vld [vmem:[#allocation10 + $0x1a8] sm:$0xff]  ;;  %v567_v17 = vld [vmem:[#allocation10 + $0x1b0] sm:$0xff] }
 0x151   : > { %v601_v25 = vmul.f32 %v538_v12, %v420_v19  ;;  %v602_v52 = vmul.f32 %v539_v13, %v419_v58  ;;  %v608_v59 = vmul.f32 %v545_v6, %v2175_v34  ;;  %v603_v3 = vmul.f32 %v540_v47, %v418_v51  ;;  %v568_v13 = vld [vmem:[#allocation10 + $0x1b8] sm:$0xff]  ;;  %v561_v58 = vld [vmem:[#allocation10 + $0x180] sm:$0xff]  ;;  %v574_v6 = vld [vmem:[#allocation10 + $0x1e8] sm:$0xff] }
 0x153   : > { %v650_v28 = vpack.c.bf16 %v601_v25, %v594_v22  ;;  %v2404_v60 = vpop.permute.xlu1 %499  ;;  %v498_v14 = vpop.permute.xlu0 %497  ;;  %v651_v37 = vpack.c.bf16 %v602_v52, %v595_v24  ;;  %v652_v12 = vpack.c.bf16 %v603_v3, %v596_v15 }
 0x154   : > { %v508_v40 = vsel %vm505_vm7, %v498_v14, %v2404_v60  ;;  %v509_v41 = vsel %vm505_vm7, %v2340_v63, %v498_v14  ;;  %v609_v63 = vmul.f32 %v546_v44, %v2182_v35 }
 0x155   : > { %v634_v45 = vmul.f32 %v571_v26, %v509_v41  ;;  %v635_v46 = vmul.f32 %v572_v27, %v508_v40  ;;  %853 = vmatprep.subr.bf16.mxu0 %v651_v37  ;;  %v575_v40 = vld [vmem:[#allocation10 + $0x1f0] sm:$0xff]  ;;  %v573_v41 = vld [vmem:[#allocation10 + $0x1e0] sm:$0xff] }
 0x156   : > { %854 = vmatpush1.bf16.msra.mxu0 %v650_v28 }
 0x157   : > { %v669_v23 = vpack.c.bf16 %v634_v45, %v634_v45  ;;  %v670_v57 = vpack.c.bf16 %v635_v46, %v635_v46  ;;  %v438_v30 = vpop.permute.xlu1 %437  ;;  %v436_v61 = vpop.permute.xlu0 %435 }
 0x158   : > { %v446_v7 = vsel %vm439_vm4, %v438_v30, %v2284_v54  ;;  %v440_v2 = vsel %vm439_vm4, %v436_v61, %v438_v30  ;;  %v441_v34 = vsel %vm439_vm4, %v2332_v53, %v436_v61  ;;  %v560_v53 = vld [vmem:[#allocation10 + $0x178] sm:$0xff]  ;;  %v678_v61 = vld [vmem:[%s2059_s29] sm:$0xff] }
 0x159   : > { %v615_v35 = vmul.f32 %v552_v43, %v441_v34  ;;  %v616_v33 = vmul.f32 %v553_v55, %v440_v2  ;;  %1399 = vmatprep.subr.msk.bf16.mxu1 %vm723_vm8, %v670_v57  ;;  %v731_v4 = vsel %vm723_vm8, %v669_v23, 0  ;;  %v617_v5 = vmul.f32 %v554_v32, %v446_v7  ;;  %v686_v32 = vld [vmem:[%s2059_s29 + $0x40] sm:$0xff] }
 0x15a   : > { %807 = vmatpush1.bf16.msra.mxu1 %v731_v4  ;;  %v699_v4 = vld [vmem:[%s2059_s29 + $0xa8] sm:$0xff] }
 0x15b   : > { %v657_v54 = vpack.c.bf16 %v615_v35, %v608_v59  ;;  %v460_v9 = vpop.permute.xlu1 %459  ;;  %1439 = vmatprep.subr.bf16.mxu1 %v2373_v49  ;;  %v458_v0 = vpop.permute.xlu0 %457  ;;  %v658_v10 = vpack.c.bf16 %v616_v33, %v609_v63  ;;  %v659_v24 = vpack.c.bf16 %v617_v5, %v610_v8  ;;  %v679_v63 = vld [vmem:[%s2059_s29 + $0x8] sm:$0xff]  ;;  %v693_v35 = vld [vmem:[%s2059_s29 + $0x78] sm:$0xff]  ;;  %v700_v5 = vld [vmem:[%s2059_s29 + $0xb0] sm:$0xff] }
 0x15c   : > { %v463_v21 = vsel %vm461_vm5, %v2371_v48, %v458_v0  ;;  %v462_v31 = vsel %vm461_vm5, %v458_v0, %v460_v9  ;;  %v468_v19 = vsel %vm461_vm5, %v460_v9, %v2312_v20 }
 0x15d   : > { %855 = vmatprep.subr.bf16.mxu0 %v658_v10  ;;  %1400 = vmatmul.mubr.msk.bf16.vlgmr.msra.gmra.mrb[0].mxu1 %vm716_vm9, %v2356_v18  ;;  %v622_v25 = vmul.f32 %v559_v11, %v463_v21  ;;  %v623_v27 = vmul.f32 %v560_v53, %v462_v31  ;;  %v624_v37 = vmul.f32 %v561_v58, %v468_v19  ;;  %v680_v53 = vld [vmem:[%s2059_s29 + $0x10] sm:$0xff]  ;;  %v681_v21 = vld [vmem:[%s2059_s29 + $0x18] sm:$0xff]  ;;  %v687_v31 = vld [vmem:[%s2059_s29 + $0x48] sm:$0xff] }
 0x15e   : > { %856 = vmatpush1.bf16.msra.mxu0 %v657_v54  ;;  %1440 = vmatpush3.bf16.msra.mxu1 %v2373_v49 }
 0x15f   : > { %v482_v48 = vpop.permute.xlu1 %481  ;;  %1441 = vmatprep.subr.bf16.mxu1 %v652_v12  ;;  %v480_v22 = vpop.permute.xlu0 %479  ;;  %840 = vmatprep.mubr.bf16.mxu1 %v1854_v36 }
 0x160   : > { %v490_v52 = vsel %vm483_vm6, %v482_v48, %v2322_v39  ;;  %v484_v49 = vsel %vm483_vm6, %v480_v22, %v482_v48  ;;  %v485_v26 = vsel %vm483_vm6, %v2383_v42, %v480_v22 }
 0x161   : > { %v631_v20 = vmul.f32 %v568_v13, %v490_v52  ;;  %v629_v28 = vmul.f32 %v566_v16, %v485_v26  ;;  %v630_v14 = vmul.f32 %v567_v17, %v484_v49  ;;  %v688_v17 = vld [vmem:[%s2059_s29 + $0x50] sm:$0xff]  ;;  %v695_v52 = vld [vmem:[%s2059_s29 + $0x88] sm:$0xff]  ;;  %v701_v26 = vld [vmem:[%s2059_s29 + $0xb8] sm:$0xff] }
 0x162   : > { %1442 = vmatpush3.bf16.msra.mxu1 %v652_v12 }
 0x163   : > { %v664_v44 = vpack.c.bf16 %v629_v28, %v622_v25  ;;  %v504_v45 = vpop.permute.xlu1 %503  ;;  %1443 = vmatprep.subr.bf16.mxu1 %v659_v24  ;;  %v502_v39 = vpop.permute.xlu0 %501  ;;  %v665_v46 = vpack.c.bf16 %v630_v14, %v623_v27  ;;  %v666_v43 = vpack.c.bf16 %v631_v20, %v624_v37  ;;  %v694_v25 = vld [vmem:[%s2059_s29 + $0x80] sm:$0xff] }
 0x164   : > { %v512_v47 = vsel %vm505_vm7, %v504_v45, %v2330_v50  ;;  %v506_v42 = vsel %vm505_vm7, %v502_v39, %v504_v45  ;;  %v507_v51 = vsel %vm505_vm7, %v2404_v60, %v502_v39  ;;  %v702_v28 = vld [vmem:[%s2059_s29 + $0xc0] sm:$0xff]  ;;  %v683_v45 = vld [vmem:[%s2059_s29 + $0x28] sm:$0xff] }
 0x165   : > { %v638_v55 = vmul.f32 %v575_v40, %v512_v47  ;;  %v636_v23 = vmul.f32 %v573_v41, %v507_v51  ;;  %v637_v57 = vmul.f32 %v574_v6, %v506_v42  ;;  %857 = vmatprep.subr.bf16.mxu0 %v665_v46  ;;  %1401 = vmatmul.mubr.msk.bf16.gmra.mrb[4].mxu1 %vm716_vm9, %v2375_v56  ;;  %v689_v46 = vld [vmem:[%s2059_s29 + $0x58] sm:$0xff]  ;;  %v690_v51 = vld [vmem:[%s2059_s29 + $0x60] sm:$0xff] }
 0x166   : > { %858 = vmatpush1.bf16.msra.mxu0 %v664_v44  ;;  %1444 = vmatpush3.bf16.msra.mxu1 %v659_v24  ;;  %v682_v44 = vld [vmem:[%s2059_s29 + $0x20] sm:$0xff] }
 0x167   : > { %v671_v30 = vpack.c.bf16 %v636_v23, %v636_v23  ;;  %v672_v50 = vpack.c.bf16 %v637_v57, %v637_v57  ;;  %1445 = vmatprep.subr.bf16.mxu1 %v666_v43  ;;  %1449 = vmatprep.mubr.msk.bf16.mxu1 %vm716_vm9, %v2356_v18  ;;  %v673_v38 = vpack.c.bf16 %v638_v55, %v638_v55  ;;  %v698_v23 = vld [vmem:[%s2059_s29 + $0xa0] sm:$0xff] }
 0x169   : > { %1402 = vmatprep.subr.msk.bf16.mxu0 %vm723_vm8, %v672_v50  ;;  %v737_v60 = vsel %vm723_vm8, %v671_v30, 0  ;;  %v743_v59 = vsel %vm723_vm8, %v673_v38, 0  ;;  %v684_v50 = vld [vmem:[%s2059_s29 + $0x30] sm:$0xff] }
 0x16a   : > { %860 = vmatpush1.bf16.msra.mxu0 %v737_v60  ;;  %1446 = vmatpush3.bf16.msra.mxu1 %v666_v43 }
 0x16b   : > { %1453 = vmatprep.subr.msk.bf16.mxu1 %vm723_vm8, %v673_v38 }
 0x16d   : > { %1403 = vmatmul.mubr.msk.bf16.vlgmr.msra.gmra.mrb[8].mxu0 %vm716_vm9, %v2356_v18 }
 0x16e   : > { %1448 = vmatpush3.bf16.msra.mxu1 %v743_v59  ;;  %893 = vmatprep.mubr.bf16.mxu0 %v1854_v36  ;;  %v705_v59 = vld [vmem:[%s2059_s29 + $0xd8] sm:$0xff] }
 0x171   : > { %1450 = vmatmul.mubr.msk.bf16.vlgmr.msra.gmra.mrb[8].mxu1 %vm716_vm9, %v2375_v56 }
 0x175   : > { %1404 = vmatmul.mubr.msk.bf16.gmra.mrb[12].mxu0 %vm716_vm9, %v2375_v56  ;;  %v692_v56 = vld [vmem:[%s2059_s29 + $0x70] sm:$0xff] }
 0x214   : > { %v779_v62 = vpop.f32.mrb[0].mxu0 }
 0x215   : > { %v780_v29 = vadd.f32 %v779_v62, %v678_v61  ;;  %v781_v18 = vpop.f32.mrb[1].mxu0  ;;  %v691_v62 = vld [vmem:[%s2059_s29 + $0x68] sm:$0xff] }
 0x216   : > { %v782_v7 = vadd.f32 %v781_v18, %v679_v63  ;;  %v783_v2 = vpop.f32.mrb[2].mxu0  ;;  %v696_v18 = vld [vmem:[%s2059_s29 + $0x90] sm:$0xff] }
 0x217   : > { %953 = vst [vmem:[#allocation4] sm:$0xff] %v780_v29  ;;  %v784_v36 = vadd.f32 %v783_v2, %v685_v1  ;;  %v785_v34 = vpop.f32.mrb[3].mxu0  ;;  %v697_v2 = vld [vmem:[%s2059_s29 + $0x98] sm:$0xff] }
 0x218   : > { %954 = vst [vmem:[#allocation4 + $0x8] sm:$0xff] %v782_v7  ;;  %v786_v3 = vadd.f32 %v785_v34, %v686_v32 }
 0x219   : > { %960 = vst [vmem:[#allocation4 + $0x38] sm:$0xff] %v784_v36 }
 0x21a   : > { %961 = vst [vmem:[#allocation4 + $0x40] sm:$0xff] %v786_v3  ;;  %v703_v3 = vld [vmem:[%s2059_s29 + $0xc8] sm:$0xff] }
 0x21c   : > { %v789_v33 = vpop.f32.mrb[4].mxu0 }
 0x21d   : > { %v790_v8 = vadd.f32 %v789_v33, %v692_v56  ;;  %v791_v15 = vpop.f32.mrb[5].mxu0  ;;  %v704_v33 = vld [vmem:[%s2059_s29 + $0xd0] sm:$0xff] }
 0x21e   : > { %v792_v54 = vadd.f32 %v791_v15, %v693_v35  ;;  %v793_v9 = vpop.f32.mrb[6].mxu0 }
 0x21f   : > { %967 = vst [vmem:[#allocation4 + $0x70] sm:$0xff] %v790_v8  ;;  %v794_v0 = vadd.f32 %v793_v9, %v699_v4  ;;  %v795_v10 = vpop.f32.mrb[7].mxu0 }
 0x220   : > { %968 = vst [vmem:[#allocation4 + $0x78] sm:$0xff] %v792_v54  ;;  %v796_v11 = vadd.f32 %v795_v10, %v700_v5 }
 0x221   : > { %974 = vst [vmem:[#allocation4 + $0xa8] sm:$0xff] %v794_v0 }
 0x222   : > { %975 = vst [vmem:[#allocation4 + $0xb0] sm:$0xff] %v796_v11 }
 0x230   : > { %v832_v12 = vpop.f32.mrb[0].mxu1 }
 0x231   : > { %v833_v13 = vadd.f32 %v832_v12, %v680_v53  ;;  %v834_v16 = vpop.f32.mrb[1].mxu1 }
 0x232   : > { %v835_v58 = vadd.f32 %v834_v16, %v681_v21  ;;  %v836_v19 = vpop.f32.mrb[2].mxu1 }
 0x233   : > { %955 = vst [vmem:[#allocation4 + $0x10] sm:$0xff] %v833_v13  ;;  %v837_v48 = vadd.f32 %v836_v19, %v687_v31  ;;  %v838_v22 = vpop.f32.mrb[3].mxu1 }
 0x234   : > { %956 = vst [vmem:[#allocation4 + $0x18] sm:$0xff] %v835_v58  ;;  %v839_v24 = vadd.f32 %v838_v22, %v688_v17 }
 0x235   : > { %962 = vst [vmem:[#allocation4 + $0x48] sm:$0xff] %v837_v48 }
 0x236   : > { %963 = vst [vmem:[#allocation4 + $0x50] sm:$0xff] %v839_v24 }
 0x238   : > { %v842_v49 = vpop.f32.mrb[4].mxu1 }
 0x239   : > { %v843_v27 = vadd.f32 %v842_v49, %v694_v25  ;;  %v844_v20 = vpop.f32.mrb[5].mxu1 }
 0x23a   : > { %v845_v14 = vadd.f32 %v844_v20, %v695_v52  ;;  %v846_v37 = vpop.f32.mrb[6].mxu1 }
 0x23b   : > { %969 = vst [vmem:[#allocation4 + $0x80] sm:$0xff] %v843_v27  ;;  %v847_v40 = vadd.f32 %v846_v37, %v701_v26  ;;  %v848_v41 = vpop.f32.mrb[7].mxu1 }
 0x23c   : > { %970 = vst [vmem:[#allocation4 + $0x88] sm:$0xff] %v845_v14  ;;  %v849_v6 = vadd.f32 %v848_v41, %v702_v28 }
 0x23d   : > { %976 = vst [vmem:[#allocation4 + $0xb8] sm:$0xff] %v847_v40 }
 0x23e   : > { %977 = vst [vmem:[#allocation4 + $0xc0] sm:$0xff] %v849_v6 }
 0x240   : > { %v885_v39 = vpop.f32.mrb[8].mxu0 }
 0x241   : > { %v886_v47 = vadd.f32 %v885_v39, %v682_v44  ;;  %v887_v42 = vpop.f32.mrb[9].mxu0 }
 0x242   : > { %v888_v43 = vadd.f32 %v887_v42, %v683_v45  ;;  %v889_v55 = vpop.f32.mrb[10].mxu0 }
 0x243   : > { %957 = vst [vmem:[#allocation4 + $0x20] sm:$0xff] %v886_v47  ;;  %v890_v57 = vadd.f32 %v889_v55, %v689_v46  ;;  %v891_v30 = vpop.f32.mrb[11].mxu0 }
 0x244   : > { %958 = vst [vmem:[#allocation4 + $0x28] sm:$0xff] %v888_v43  ;;  %v892_v38 = vadd.f32 %v891_v30, %v690_v51  ;;  %v1451_v60 = vpop.f32.mrb[8].mxu1 }
 0x245   : > { %964 = vst [vmem:[#allocation4 + $0x58] sm:$0xff] %v890_v57  ;;  %v947_v61 = vadd.f32 %v1451_v60, %v698_v23  ;;  %v938_v63 = vpop.f32.mrb[9].mxu1 }
 0x246   : > { %965 = vst [vmem:[#allocation4 + $0x60] sm:$0xff] %v892_v38  ;;  %v939_v1 = vadd.f32 %v938_v63, %v684_v50  ;;  %v1452_v29 = vpop.f32.mrb[10].mxu1 }
 0x247   : > { %973 = vst [vmem:[#allocation4 + $0xa0] sm:$0xff] %v947_v61  ;;  %v950_v32 = vadd.f32 %v1452_v29, %v705_v59  ;;  %v941_v7 = vpop.f32.mrb[11].mxu1 }
 0x248   : > { %959 = vst [vmem:[#allocation4 + $0x30] sm:$0xff] %v939_v1  ;;  %v895_v36 = vpop.f32.mrb[12].mxu0  ;;  %v942_v34 = vadd.f32 %v941_v7, %v691_v62 }
 0x249   : > { %980 = vst [vmem:[#allocation4 + $0xd8] sm:$0xff] %v950_v32  ;;  %v896_v56 = vadd.f32 %v895_v36, %v696_v18  ;;  %v897_v35 = vpop.f32.mrb[13].mxu0 }
 0x24a   : > { %966 = vst [vmem:[#allocation4 + $0x68] sm:$0xff] %v942_v34  ;;  %v898_v4 = vadd.f32 %v897_v35, %v697_v2  ;;  %v899_v8 = vpop.f32.mrb[14].mxu0 }
 0x24b   : > { %971 = vst [vmem:[#allocation4 + $0x90] sm:$0xff] %v896_v56  ;;  %v900_v15 = vadd.f32 %v899_v8, %v703_v3  ;;  %v901_v5 = vpop.f32.mrb[15].mxu0 }
 0x24c   : > { %972 = vst [vmem:[#allocation4 + $0x98] sm:$0xff] %v898_v4  ;;  %v902_v54 = vadd.f32 %v901_v5, %v704_v33 }
 0x24d   : > { %978 = vst [vmem:[#allocation4 + $0xc8] sm:$0xff] %v900_v15 }
 0x24e   : > { %979 = vst [vmem:[#allocation4 + $0xd0] sm:$0xff] %v902_v54 }
 0x24f PF: > { %v981_v9 = vld [vmem:[#allocation4] sm:$0xff]  ;;  %v982_v0 = vld [vmem:[#allocation4 + $0x8] sm:$0xff]  ;;  %v983_v10 = vld [vmem:[#allocation4 + $0x10] sm:$0xff]  ;;  %s1459_s6 = smul.u32 3584, %s1905_s19  ;;  %s1259_s12 = sshll.u32 %s2072_s8, 4  ;;  %s2573_s12 = int_to_ptr.vmem [resolvable:$true] %s1259_s12 }
 0x250   : > { %v1407_v11 = vmul.f32 -1.442695, %v981_v9  ;;  %1177 = vst [vmem:[%s2072_s8] sm:$0xff] %v981_v9  ;;  %v1408_v53 = vmul.f32 -1.442695, %v982_v0  ;;  %1178 = vst [vmem:[%s2072_s8 + $0x8] sm:$0xff] %v982_v0  ;;  %v984_v12 = vld [vmem:[#allocation4 + $0x18] sm:$0xff] }
 0x251   : > { %v1409_v21 = vmul.f32 -1.442695, %v983_v10  ;;  %1179 = vst [vmem:[%s2072_s8 + $0x10] sm:$0xff] %v983_v10  ;;  %v985_v31 = vld [vmem:[#allocation4 + $0x20] sm:$0xff]  ;;  %v986_v13 = vld [vmem:[#allocation4 + $0x28] sm:$0xff]  ;;  %1180 = vst [vmem:[%s2072_s8 + $0x18] sm:$0xff] %v984_v12  ;;  %s2571_s29 = scalar_lea.hbm %s2683_s4, %s1459_s6 }
 0x252   : > { %1550 = vpow2.f32 %v1407_v11  ;;  %v1410_v16 = vmul.f32 -1.442695, %v984_v12  ;;  %v1411_v17 = vmul.f32 -1.442695, %v985_v31  ;;  %1181 = vst [vmem:[%s2072_s8 + $0x20] sm:$0xff] %v985_v31  ;;  %1182 = vst [vmem:[%s2072_s8 + $0x28] sm:$0xff] %v986_v13 }
 0x253   : > { %1552 = vpow2.f32 %v1408_v53  ;;  %v1412_v58 = vmul.f32 -1.442695, %v986_v13  ;;  %v987_v19 = vld [vmem:[#allocation4 + $0x30] sm:$0xff]  ;;  %v988_v48 = vld [vmem:[#allocation4 + $0x38] sm:$0xff]  ;;  %v989_v22 = vld [vmem:[#allocation4 + $0x40] sm:$0xff]  ;;  %s1232_s23 = scalar_lea.sflag [#allocation13], %s2055_s10 }
 0x254   : > { %1554 = vpow2.f32 %v1409_v21  ;;  %1183 = vst [vmem:[%s2072_s8 + $0x30] sm:$0xff] %v987_v19  ;;  %1184 = vst [vmem:[%s2072_s8 + $0x38] sm:$0xff] %v988_v48  ;;  %v1414_v24 = vmul.f32 -1.442695, %v988_v48  ;;  %v990_v25 = vld [vmem:[#allocation4 + $0x48] sm:$0xff]  ;;  %v991_v52 = vld [vmem:[#allocation4 + $0x50] sm:$0xff] }
 0x255   : > { %1185 = vst [vmem:[%s2072_s8 + $0x40] sm:$0xff] %v989_v22  ;;  %1556 = vpow2.f32 %v1410_v16  ;;  %v992_v49 = vld [vmem:[#allocation4 + $0x58] sm:$0xff]  ;;  %v1415_v26 = vmul.f32 -1.442695, %v989_v22  ;;  %1186 = vst [vmem:[%s2072_s8 + $0x48] sm:$0xff] %v990_v25  ;;  %v993_v20 = vld [vmem:[#allocation4 + $0x60] sm:$0xff] }
 0x256   : > { %1558 = vpow2.f32 %v1411_v17  ;;  %1187 = vst [vmem:[%s2072_s8 + $0x50] sm:$0xff] %v991_v52  ;;  %1188 = vst [vmem:[%s2072_s8 + $0x58] sm:$0xff] %v992_v49  ;;  %v1416_v27 = vmul.f32 -1.442695, %v990_v25  ;;  %v2515_v28 = vld [vmem:[#allocation4 + $0x68] sm:$0xff]  ;;  %v2517_v14 = vld [vmem:[#allocation4 + $0x70] sm:$0xff] }
 0x257   : > { %1560 = vpow2.f32 %v1412_v58  ;;  %v1417_v37 = vmul.f32 -1.442695, %v991_v52  ;;  %1189 = vst [vmem:[%s2072_s8 + $0x60] sm:$0xff] %v993_v20  ;;  %1190 = vst [vmem:[%s2072_s8 + $0x68] sm:$0xff] %v2515_v28  ;;  %v2524_v40 = vld [vmem:[#allocation4 + $0x78] sm:$0xff]  ;;  %v2528_v6 = vld [vmem:[#allocation4 + $0x80] sm:$0xff] }
 0x258   : > { %1191 = vst [vmem:[%s2072_s8 + $0x70] sm:$0xff] %v2517_v14  ;;  %1562 = vpow2.f32 %v1414_v24  ;;  %v1418_v41 = vmul.f32 -1.442695, %v992_v49  ;;  %1192 = vst [vmem:[%s2072_s8 + $0x78] sm:$0xff] %v2524_v40  ;;  %v1419_v44 = vmul.f32 -1.442695, %v993_v20 }
 0x259   : > { %1564 = vpow2.f32 %v1415_v26  ;;  %1193 = vst [vmem:[%s2072_s8 + $0x80] sm:$0xff] %v2528_v6  ;;  %v2532_v45 = vld [vmem:[#allocation4 + $0x88] sm:$0xff]  ;;  %v2534_v39 = vld [vmem:[#allocation4 + $0x90] sm:$0xff]  ;;  %v1413_v46 = vmul.f32 -1.442695, %v987_v19  ;;  %v2541_v47 = vld [vmem:[#allocation4 + $0x98] sm:$0xff] }
 0x25a   : > { %1566 = vpow2.f32 %v1416_v27  ;;  %1194 = vst [vmem:[%s2072_s8 + $0x88] sm:$0xff] %v2532_v45  ;;  %1195 = vst [vmem:[%s2072_s8 + $0x90] sm:$0xff] %v2534_v39  ;;  %v2546_v51 = vld [vmem:[#allocation4 + $0xa0] sm:$0xff]  ;;  %v2548_v43 = vld [vmem:[#allocation4 + $0xa8] sm:$0xff]  ;;  %s1734_s21 = scalar_lea.vmem %s2573_s12, 3584  ;;  %s1855_s27 = smov [#allocation12]  }
 0x25b   : > { %1568 = vpow2.f32 %v1417_v37  ;;  %1196 = vst [vmem:[%s2072_s8 + $0x98] sm:$0xff] %v2541_v47  ;;  %1197 = vst [vmem:[%s2072_s8 + $0xa0] sm:$0xff] %v2546_v51  ;;  %v2554_v57 = vld [vmem:[#allocation4 + $0xb0] sm:$0xff]  ;;  %v2556_v30 = vld [vmem:[#allocation4 + $0xb8] sm:$0xff]  ;;  %p1735_p4 = scmp.ne.s32.totalorder %s2573_s12, %s1734_s21  ;;  %s1738_s5 = sshll.u32 %s1855_s27, 4  ;;  %s1739_s5 = int_to_ptr.vmem [resolvable:$false] %s1738_s5 }
 0x25c   : > { %v1551_v42 = vpop.eup %1550  ;;  %1570 = vpow2.f32 %v1418_v41  ;;  %1198 = vst [vmem:[%s2072_s8 + $0xa8] sm:$0xff] %v2548_v43  ;;  %v2558_v50 = vld [vmem:[#allocation4 + $0xc0] sm:$0xff]  ;;  %1199 = vst [vmem:[%s2072_s8 + $0xb0] sm:$0xff] %v2554_v57  ;;  %v2566_v59 = vld [vmem:[#allocation4 + $0xc8] sm:$0xff]  ;;  %s1740_s25 = scalar_lea.vmem %s1739_s5, 7168  ;;  %p1741_p3 = scmp.lt.s32.totalorder %s2573_s12, %s1739_s5 }
 0x25d   : > { %v1553_v55 = vpop.eup %1552  ;;  %v1030_v23 = vadd.f32 1.0, %v1551_v42  ;;  %1572 = vpow2.f32 %v1419_v44  ;;  %1200 = vst [vmem:[%s2072_s8 + $0xb8] sm:$0xff] %v2556_v30  ;;  %1201 = vst [vmem:[%s2072_s8 + $0xc0] sm:$0xff] %v2558_v50  ;;  %v2577_v62 = vld [vmem:[#allocation4 + $0xd0] sm:$0xff]  ;;  %v2581_v18 = vld [vmem:[#allocation4 + $0xd8] sm:$0xff]  ;;  %p1736_p9 = pnand %p1735_p4, %p2003_p6  ;;  %p1742_p7 = scmp.lt.s32.totalorder %s1740_s25, %s1734_s21 }
 0x25e   : > { %v1555_v38 = vpop.eup %1554  ;;  %v1031_v60 = vadd.f32 1.0, %v1553_v55  ;;  %1574 = vpow2.f32 %v1413_v46  ;;  %1202 = vst [vmem:[%s2072_s8 + $0xc8] sm:$0xff] %v2566_v59  ;;  %1203 = vst [vmem:[%s2072_s8 + $0xd0] sm:$0xff] %v2577_v62 }
 0x25f   : > { %v1557_v61 = vpop.eup %1556  ;;  %v1032_v63 = vadd.f32 1.0, %v1555_v38  ;;  %1576 = vrcp.f32 %v1030_v23  ;;  %1204 = vst [vmem:[%s2072_s8 + $0xd8] sm:$0xff] %v2581_v18  ;;  %p1737_p12 = pneg %p1736_p9  ;;  %p1743_p10 = por %p1742_p7, %p1741_p3 }
 0x260   : > { %v1559_v1 = vpop.eup %1558  ;;  %v1033_v29 = vadd.f32 1.0, %v1557_v61  ;;  %1578 = vrcp.f32 %v1031_v60 }
 0x261   : > { %v1561_v32 = vpop.eup %1560  ;;  %v1034_v7 = vadd.f32 1.0, %v1559_v1  ;;  %1580 = vrcp.f32 %v1032_v63  ;;  %p1744_p13 = pnand %p1743_p10, %p1737_p12 }
 0x262   : > { %v1035_v2 = vadd.f32 1.0, %v1561_v32 }
 0x263   : > { %1747 = shalt.err (!%p1744_p13)
}
 0x264   : > { %s1748_s8 = scalar_lea.hbm %s2571_s29, 3584  ;;  %s1752_s20 = scalar_lea.hbm %s2683_s4, 14336 }
 0x265   : > { %p1749_p0 = scmp.ne.s32.totalorder %s2571_s29, %s1748_s8  ;;  %p1753_p8 = scmp.lt.u32.totalorder %s2571_s29, %s2683_s4 }
 0x266   : > { %p1754_p1 = scmp.lt.u32.totalorder %s1752_s20, %s1748_s8  ;;  %p1756_p4 = scmp.lt.u32.totalorder %s1748_s8, %s2571_s29 }
 0x267   : > { %p1750_p5 = pnand %p1749_p0, %p2003_p6 }
 0x268   : > { %p1755_p2 = por %p1754_p1, %p1753_p8 }
 0x269   : > { %p1751_p11 = pneg %p1750_p5 }
 0x26a   : > { %p1757_p9 = por %p1756_p4, %p1755_p2 }
 0x26c   : > { %p1758_p12 = pnand %p1757_p9, %p1751_p11 }
 0x26e   : > { %1761 = shalt.err (!%p1758_p12)
}
 0x26f   : > { %s1856_s13 = smov 896   ;;  %s1857_s28 = smov 56   ;;  %v1563_v36 = vpop.eup %1562  ;;  %1582 = vrcp.f32 %v1033_v29  ;;  %v1420_v9 = vmul.f32 -1.442695, %v2515_v28  ;;  %v1421_v11 = vmul.f32 -1.442695, %v2548_v43 }
 0x270   : > { %1471 = dma.vmem_to_hbm [thread:$0]  (%p2003_p6), %s2573_s12, 3584, %s2571_s29, %s1232_s23, %s1856_s13, %s1856_s13, %s1857_s28   ;;  %v1565_v34 = vpop.eup %1564  ;;  %1584 = vrcp.f32 %v1034_v7  ;;  %v1072_v3 = vadd.f32 1.0, %v1563_v36  ;;  %v1422_v21 = vmul.f32 -1.442695, %v2554_v57  ;;  %v1423_v31 = vmul.f32 -1.442695, %v2556_v30 }
 0x271   : > { %v1567_v56 = vpop.eup %1566  ;;  %1586 = vrcp.f32 %v1035_v2  ;;  %v1073_v35 = vadd.f32 1.0, %v1565_v34  ;;  %v1424_v16 = vmul.f32 -1.442695, %v2558_v50  ;;  %v1425_v58 = vmul.f32 -1.442695, %v2566_v59  ;;  %v1135_v48 = vld [vmem:[#allocation3] sm:$0xff] }
 0x272   : > { %v1569_v33 = vpop.eup %1568  ;;  %1588 = vrcp.f32 %v1072_v3  ;;  %v1074_v4 = vadd.f32 1.0, %v1567_v56  ;;  %v1426_v22 = vmul.f32 -1.442695, %v2577_v62  ;;  %v1136_v49 = vld [vmem:[#allocation3 + $0x8] sm:$0xff]  ;;  %v1137_v20 = vld [vmem:[#allocation3 + $0x10] sm:$0xff]  ;;  %v1138_v46 = vld [vmem:[#allocation3 + $0x18] sm:$0xff] }
 0x273   : > { %v1571_v8 = vpop.eup %1570  ;;  %1590 = vrcp.f32 %v1073_v35  ;;  %v1075_v15 = vadd.f32 1.0, %v1569_v33  ;;  %v1427_v28 = vmul.f32 -1.442695, %v2581_v18  ;;  %v1140_v50 = vld [vmem:[#allocation3 + $0x28] sm:$0xff]  ;;  %s1458_s12 = smul.u32 896, %s1905_s19  ;;  %s1246_s29 = sshll.u32 %s2070_s7, 4  ;;  %s2637_s29 = int_to_ptr.vmem [resolvable:$true] %s1246_s29 }
 0x274   : > { %v1573_v5 = vpop.eup %1572  ;;  %1592 = vrcp.f32 %v1074_v4  ;;  %v1076_v54 = vadd.f32 1.0, %v1571_v8  ;;  %s1227_s5 = scalar_lea.sflag [#allocation7], %s2055_s10  ;;  %s1762_s25 = scalar_lea.vmem %s2637_s29, 896 }
 0x275   : > { %v1575_v0 = vpop.eup %1574  ;;  %1594 = vrcp.f32 %v1075_v15  ;;  %v1077_v10 = vadd.f32 1.0, %v1573_v5  ;;  %s2635_s27 = scalar_lea.hbm %s2682_s3, %s1458_s12  ;;  %p1763_p3 = scmp.ne.s32.totalorder %s2637_s29, %s1762_s25 }
 0x276   : > { %v1577_v53 = vpop.eup %1576  ;;  %1596 = vrcp.f32 %v1076_v54  ;;  %v1036_v25 = vadd.f32 1.0, %v1575_v0  ;;  %s1858_s19 = smov [#allocation11]  }
 0x277   : > { %v1579_v12 = vpop.eup %1578  ;;  %1598 = vrcp.f32 %v1077_v10  ;;  %v1149_v52 = vmul.f32 %v1577_v53, %v2517_v14  ;;  %v1139_v14 = vld [vmem:[#allocation3 + $0x20] sm:$0xff]  ;;  %p1764_p7 = pnand %p1763_p3, %p2003_p6  ;;  %s1766_s8 = sshll.u32 %s1858_s19, 4  ;;  %s1767_s8 = int_to_ptr.vmem [resolvable:$false] %s1766_s8 }
 0x278   : > { %v1581_v13 = vpop.eup %1580  ;;  %1600 = vpow2.f32 %v1420_v9  ;;  %v1150_v27 = vmul.f32 %v1579_v12, %v2524_v40  ;;  %s1768_s9 = scalar_lea.vmem %s1767_s8, 1792  ;;  %p1769_p13 = scmp.lt.s32.totalorder %s2637_s29, %s1767_s8 }
 0x279   : > { %v1583_v17 = vpop.eup %1582  ;;  %1602 = vpow2.f32 %v1421_v11  ;;  %v1151_v44 = vmul.f32 %v1581_v13, %v2528_v6  ;;  %v1141_v11 = vld [vmem:[#allocation3 + $0x30] sm:$0xff]  ;;  %p1765_p10 = pneg %p1764_p7  ;;  %p1770_p0 = scmp.lt.s32.totalorder %s1768_s9, %s1762_s25 }
 0x27a   : > { %v1585_v19 = vpop.eup %1584  ;;  %1604 = vpow2.f32 %v1422_v21  ;;  %v1152_v55 = vmul.f32 %v1583_v17, %v2532_v45 }
 0x27b   : > { %v1587_v24 = vpop.eup %1586  ;;  %1606 = vpow2.f32 %v1423_v31  ;;  %v1153_v30 = vmul.f32 %v1585_v19, %v2534_v39  ;;  %p1771_p5 = por %p1770_p0, %p1769_p13 }
 0x27c   : > { %v1589_v26 = vpop.eup %1588  ;;  %1608 = vpow2.f32 %v1424_v16  ;;  %v1154_v6 = vmul.f32 %v1587_v24, %v2541_v47 }
 0x27d   : > { %v1591_v37 = vpop.eup %1590  ;;  %v1142_v41 = vmul.f32 %v1589_v26, %v1135_v48  ;;  %1610 = vpow2.f32 %v1425_v58  ;;  %p1772_p11 = pnand %p1771_p5, %p1765_p10 }
 0x27e   : > { %v1593_v42 = vpop.eup %1592  ;;  %v1143_v43 = vmul.f32 %v1591_v37, %v1136_v49  ;;  %1612 = vpow2.f32 %v1426_v22 }
 0x27f   : > { %v1595_v23 = vpop.eup %1594  ;;  %1614 = vrcp.f32 %v1036_v25  ;;  %v1156_v57 = vadd.f32 %v1149_v52, %v1142_v41  ;;  %v1144_v40 = vmul.f32 %v1593_v42, %v1137_v20 }
 0x280   : > { %v1597_v38 = vpop.eup %1596  ;;  %v1157_v60 = vadd.f32 %v1150_v27, %v1143_v43  ;;  %v1145_v59 = vmul.f32 %v1595_v23, %v1138_v46  ;;  %1616 = vpow2.f32 %v1427_v28 }
 0x281   : > { %v1599_v61 = vpop.eup %1598  ;;  %1618 = vtanh.f32 %v1156_v57  ;;  %1212 = vst [vmem:[#allocation3] sm:$0xff] %v1156_v57  ;;  %v1158_v63 = vadd.f32 %v1151_v44, %v1144_v40  ;;  %v1146_v45 = vmul.f32 %v1597_v38, %v1139_v14 }
 0x282   : > { %v1601_v62 = vpop.eup %1600  ;;  %1620 = vtanh.f32 %v1157_v60  ;;  %1213 = vst [vmem:[#allocation3 + $0x8] sm:$0xff] %v1157_v60  ;;  %v1159_v1 = vadd.f32 %v1152_v55, %v1145_v59  ;;  %v1147_v29 = vmul.f32 %v1599_v61, %v1140_v50 }
 0x283   : > { %v1603_v18 = vpop.eup %1602  ;;  %v1078_v32 = vadd.f32 1.0, %v1601_v62  ;;  %1622 = vtanh.f32 %v1158_v63  ;;  %1214 = vst [vmem:[#allocation3 + $0x10] sm:$0xff] %v1158_v63  ;;  %v1160_v39 = vadd.f32 %v1153_v30, %v1146_v45 }
 0x284   : > { %v1605_v7 = vpop.eup %1604  ;;  %1624 = vtanh.f32 %v1159_v1  ;;  %1215 = vst [vmem:[#allocation3 + $0x18] sm:$0xff] %v1159_v1  ;;  %v1161_v47 = vadd.f32 %v1154_v6, %v1147_v29  ;;  %v1114_v2 = vadd.f32 1.0, %v1603_v18 }
 0x285   : > { %v1607_v36 = vpop.eup %1606  ;;  %1626 = vrcp.f32 %v1078_v32  ;;  %1216 = vst [vmem:[#allocation3 + $0x20] sm:$0xff] %v1160_v39  ;;  %v1115_v34 = vadd.f32 1.0, %v1605_v7 }
 0x286   : > { %v1609_v3 = vpop.eup %1608  ;;  %1628 = vtanh.f32 %v1160_v39  ;;  %1217 = vst [vmem:[#allocation3 + $0x28] sm:$0xff] %v1161_v47  ;;  %v1116_v56 = vadd.f32 1.0, %v1607_v36 }
 0x287   : > { %v1611_v35 = vpop.eup %1610  ;;  %1630 = vtanh.f32 %v1161_v47  ;;  %v1117_v33 = vadd.f32 1.0, %v1609_v3 }
 0x288   : > { %v1613_v4 = vpop.eup %1612  ;;  %1632 = vrcp.f32 %v1114_v2  ;;  %v1118_v8 = vadd.f32 1.0, %v1611_v35 }
 0x289   : > { %v1615_v15 = vpop.eup %1614  ;;  %1634 = vrcp.f32 %v1115_v34  ;;  %v1119_v5 = vadd.f32 1.0, %v1613_v4 }
 0x28a   : > { %v1617_v54 = vpop.eup %1616  ;;  %1636 = vrcp.f32 %v1116_v56  ;;  %v1155_v21 = vmul.f32 %v1615_v15, %v2546_v51 }
 0x28b   : > { %v1619_v9 = vpop.eup %1618  ;;  %1638 = vrcp.f32 %v1117_v33  ;;  %v1120_v12 = vadd.f32 1.0, %v1617_v54 }
 0x28c   : > { %v1621_v0 = vpop.eup %1620  ;;  %1640 = vrcp.f32 %v1118_v8 }
 0x28d   : > { %v1623_v10 = vpop.eup %1622  ;;  %1642 = vrcp.f32 %v1119_v5 }
 0x28e   : > { %v1625_v53 = vpop.eup %1624  ;;  %1644 = vrcp.f32 %v1120_v12 }
 0x28f   : > { %v1627_v31 = vpop.eup %1626 }
 0x290   : > { %v1629_v13 = vpop.eup %1628  ;;  %v1148_v16 = vmul.f32 %v1627_v31, %v1141_v11 }
 0x291   : > { %v1631_v17 = vpop.eup %1630 }
 0x292   : > { %v1633_v58 = vpop.eup %1632  ;;  %v1162_v19 = vadd.f32 %v1155_v21, %v1148_v16 }
 0x293   : > { %v1635_v48 = vpop.eup %1634  ;;  %v1170_v22 = vmul.f32 %v1633_v58, %v1619_v9 }
 0x294   : > { %v1637_v24 = vpop.eup %1636  ;;  %1646 = vtanh.f32 %v1162_v19  ;;  %1218 = vst [vmem:[#allocation3 + $0x30] sm:$0xff] %v1162_v19  ;;  %v1171_v25 = vmul.f32 %v1635_v48, %v1621_v0 }
 0x295   : > { %v1639_v51 = vpop.eup %1638  ;;  %1205 = vst [vmem:[%s2070_s7] sm:$0xff] %v1170_v22  ;;  %1219 = vst [vmem:[#allocation2] sm:$0xff] %v1170_v22  ;;  %v1172_v52 = vmul.f32 %v1637_v24, %v1623_v10 }
 0x296   : > { %v1641_v49 = vpop.eup %1640  ;;  %1206 = vst [vmem:[%s2070_s7 + $0x8] sm:$0xff] %v1171_v25  ;;  %1220 = vst [vmem:[#allocation2 + $0x8] sm:$0xff] %v1171_v25  ;;  %v1173_v26 = vmul.f32 %v1639_v51, %v1625_v53 }
 0x297   : > { %v1643_v27 = vpop.eup %1642  ;;  %1207 = vst [vmem:[%s2070_s7 + $0x10] sm:$0xff] %v1172_v52  ;;  %1221 = vst [vmem:[#allocation2 + $0x10] sm:$0xff] %v1172_v52  ;;  %v1174_v20 = vmul.f32 %v1641_v49, %v1629_v13 }
 0x298   : > { %1208 = vst [vmem:[%s2070_s7 + $0x18] sm:$0xff] %v1173_v26  ;;  %1222 = vst [vmem:[#allocation2 + $0x18] sm:$0xff] %v1173_v26  ;;  %v1175_v28 = vmul.f32 %v1643_v27, %v1631_v17  ;;  %v1645_v37 = vpop.eup %1644 }
 0x299   : > { %1209 = vst [vmem:[%s2070_s7 + $0x20] sm:$0xff] %v1174_v20  ;;  %1223 = vst [vmem:[#allocation2 + $0x20] sm:$0xff] %v1174_v20 }
 0x29a   : > { %1210 = vst [vmem:[%s2070_s7 + $0x28] sm:$0xff] %v1175_v28  ;;  %1224 = vst [vmem:[#allocation2 + $0x28] sm:$0xff] %v1175_v28 }
 0x29e   : > { %v1647_v41 = vpop.eup %1646 }
 0x29f   : > { %v1176_v44 = vmul.f32 %v1647_v41, %v1645_v37 }
 0x2a1   : > { %1211 = vst [vmem:[%s2070_s7 + $0x30] sm:$0xff] %v1176_v44  ;;  %1225 = vst [vmem:[#allocation2 + $0x30] sm:$0xff] %v1176_v44 }
 0x2a2   : > { %1775 = shalt.err (!%p1772_p11)
}
 0x2a3   : > { %s1776_s10 = scalar_lea.hbm %s2635_s27, 896  ;;  %s1780_s20 = scalar_lea.hbm %s2682_s3, 3584 }
 0x2a4   : > { %p1777_p8 = scmp.ne.s32.totalorder %s2635_s27, %s1776_s10  ;;  %p1781_p4 = scmp.lt.u32.totalorder %s2635_s27, %s2682_s3 }
 0x2a5   : > { %p1782_p9 = scmp.lt.u32.totalorder %s1780_s20, %s1776_s10  ;;  %p1784_p3 = scmp.lt.u32.totalorder %s1776_s10, %s2635_s27 }
 0x2a6   : > { %p1778_p1 = pnand %p1777_p8, %p2003_p6 }
 0x2a7   : > { %p1783_p12 = por %p1782_p9, %p1781_p4 }
 0x2a8   : > { %p1779_p2 = pneg %p1778_p1 }
 0x2a9   : > { %p1785_p7 = por %p1784_p3, %p1783_p12 }
 0x2ab   : > { %p1786_p10 = pnand %p1785_p7, %p1779_p2 }
 0x2ad   : > { %1789 = shalt.err (!%p1786_p10)
}
 0x2ae   : > { %1470 = dma.vmem_to_hbm [thread:$0]  (%p2003_p6), %s2637_s29, 896, %s2635_s27, %s1227_s5  }
 0x2af PF: > { %p1497_p13 = scmp.ge.s32.totalorder %s1836_s18, 2  ;;  %s1274_s13 = sand.u32 1, %s1824_s15  }
 0x2b0   : > { %p2699_p0 = scmp.ne.s32.totalorder %s2688_s22, 0  ;;  %s1275_s28 = scalar_lea.sflag [#allocation7], %s1274_s13 }
 0x2b2   : > { %p1486_p5 = pnand %p1497_p13, %p2699_p0 }
 0x2b4   : > { %1815 = dma.done.wait (!%p1486_p5), %s1275_s28, 896  }
 0x2b5   : > { %1817 = vsyncadd (!%p1486_p5), %s1275_s28, 4294966400  ;;  %s1284_s12 = scalar_lea.sflag [#allocation13], %s1274_s13 }
 0x2b6   : > { %1819 = dma.done.wait (!%p1486_p5), %s1284_s12, 3584  }
 0x2b7   : > { %1821 = vsyncadd (!%p1486_p5), %s1284_s12, 4294963712  ;;  %p22_p6 = scmp.ge.s32.totalorder %s1990_s11, 6   ;;  %s2700_s15 = smov %s1828_s16 }
 0x2b8   : > { %s2701_s16 = smov %s1832_s17  ;;  %s2702_s17 = smov %s1999_s14 }
 0x2b9   : > { %s2703_s18 = smov %s1990_s11  ;;  %24 = sbr.rel (!%p22_p6) target bundleno = 8 (0x8), region = 110 }
 0x2c0   :  { %1289 = vsyncpa [#allocation6], 1 }
 0x2c1   :  { %1291 = vsyncpa [#allocation6 + $0x1], 1 }
 0x2c2   :  { %1292 = vsyncpa [#allocation9], 1 }
 0x2c3   :  { %1293 = vsyncpa [#allocation7], 1 }
 0x2c4   :  { %1295 = vsyncpa [#allocation7 + $0x1], 1 }
 0x2c5   :  { %1296 = vsyncpa [#allocation13], 1 }
 0x2c6   :  { %1298 = vsyncpa [#allocation13 + $0x1], 1 }

</bundles_post_ra>
